<compile_context>
chip_gen: v7x
topology: tpu7x:2x2x1
jax: 0.10.0
libtpu: 0.0.40
codegen_flags: <defaults>
</compile_context>

<pallas_src>
import jax
import jax.numpy as jnp
from jax import lax
from jax.experimental import pallas as pl
from jax.experimental.pallas import tpu as pltpu


def _gelu_sigmoid(x):
    # Cheap GELU: x * sigmoid(1.702 x) == 0.5 * x * (1 + tanh(0.851 x)).
    return 0.5 * x * (1.0 + jnp.tanh(0.851 * x))


def proxy_mlp_kernel(x_ref, w0_ref, b0_ref, w1_ref, b1_ref, w2_ref, b2_ref, o_ref):
    # x arrives in its natural (tb, x_dim) layout; the NT contraction below
    # transposes it in-VMEM (cheap XLU work hidden under the matmul) so the
    # batch lands on the lane axis for everything downstream.
    x_bf = x_ref[...].astype(jnp.bfloat16)
    # Input layer: (hidden, x_dim) x (tb, x_dim)^T -> (hidden, tb), f32 acc.
    h = lax.dot_general(w0_ref[...], x_bf,
                        dimension_numbers=(((1,), (1,)), ((), ())),
                        preferred_element_type=jnp.float32)
    h = _gelu_sigmoid(h + b0_ref[...])
    # Hidden layer (num_hidden_layers = 1): (hidden, hidden) @ (hidden, tb).
    h = jnp.dot(w1_ref[...], h.astype(jnp.bfloat16),
                preferred_element_type=jnp.float32)
    h = _gelu_sigmoid(h + b1_ref[...])
    # Output layer: (out_dim, hidden) @ (hidden, tb) -> lane-dense (out_dim, tb).
    out = jnp.dot(w2_ref[...], h.astype(jnp.bfloat16),
                  preferred_element_type=jnp.float32) + b2_ref[...]
    o_ref[...] = out.astype(o_ref.dtype)


def _round_up(n, m):
    return ((n + m - 1) // m) * m


def _num_batch_tiles(padded_B):
    """1 grid step on single-TC chips (v5e/v6e); 2 parallel steps on dual-TC
    v7x when per-tile compute exceeds the ~0.35us/step pipeline overhead."""
    try:
        kind = jax.devices()[0].device_kind.lower()
    except Exception:
        return 1
    if "v7" in kind and padded_B >= 512:
        return 2
    return 1


def prepare_proxy_params(params):
    """One-time parameter prep (call once, reuse across forward calls):
    bf16 weight copies (native MXU rate, half the DMA bytes), f32 column
    biases.  Input layout is the PyTorch nn.Linear one: W (out, in), b (out,)."""
    w0, b0, w1, b1, w2, b2 = params
    col = lambda b: b.reshape(-1, 1).astype(jnp.float32)
    return (w0.astype(jnp.bfloat16), col(b0),
            w1.astype(jnp.bfloat16), col(b1),
            w2.astype(jnp.bfloat16), col(b2))


def proxy_forward(x, prepared_params, *, num_tiles=None):
    """Fused Proxy MLP forward. x: (B, x_dim) f32 -> (B, output_dim) f32."""
    w0, b0, w1, b1, w2, b2 = prepared_params
    B, x_dim = x.shape
    hidden = w0.shape[0]
    out_dim = w2.shape[0]

    # Batch lives on the lane axis inside the kernel: round to 128 lanes so
    # every elementwise op and the output store is unmasked lane-dense.
    padded_B = _round_up(B, 128)
    if num_tiles is None:
        num_tiles = _num_batch_tiles(padded_B)
    tb = _round_up(-(-padded_B // num_tiles), 128)
    padded_B = tb * num_tiles

    # Only wrapper op left (and only when B % 128 != 0): a tiny zero-pad of x.
    x_in = x if padded_B == B else jnp.pad(x, ((0, padded_B - B), (0, 0)))

    # Advisory cost hint so XLA schedules surrounding ops sensibly.
    flops = 2 * padded_B * (x_dim * hidden + hidden * hidden + hidden * out_dim)
    transcendentals = 2 * padded_B * hidden
    bytes_accessed = (x_in.size * 4 + (w0.size + w1.size + w2.size) * 2
                      + (b0.size + b1.size + b2.size) * 4
                      + padded_B * out_dim * 4)

    resident = lambda i: (0, 0)  # weights/biases: same block every grid step
    out_t = pl.pallas_call(
        proxy_mlp_kernel,
        out_shape=jax.ShapeDtypeStruct((out_dim, padded_B), jnp.float32),
        grid_spec=pltpu.PrefetchScalarGridSpec(
            num_scalar_prefetch=0,
            grid=(num_tiles,),
            in_specs=[
                pl.BlockSpec((tb, x_dim), lambda i: (i, 0)),   # x tile (natural layout, f32)
                pl.BlockSpec((hidden, x_dim), resident),       # W0 (bf16)
                pl.BlockSpec((hidden, 1), resident),           # b0 (f32)
                pl.BlockSpec((hidden, hidden), resident),      # W1 (bf16)
                pl.BlockSpec((hidden, 1), resident),           # b1 (f32)
                pl.BlockSpec((out_dim, hidden), resident),     # W2 (bf16)
                pl.BlockSpec((out_dim, 1), resident),          # b2 (f32)
            ],
            out_specs=pl.BlockSpec((out_dim, tb), lambda i: (0, i)),
        ),
        compiler_params=pltpu.CompilerParams(
            dimension_semantics=("parallel",),
        ),
        cost_estimate=pl.CostEstimate(
            flops=flops,
            transcendentals=transcendentals,
            bytes_accessed=bytes_accessed,
        ),
    )(x_in, w0, b0, w1, b1, w2, b2)

    # (out_dim, padded_B) -> (B, out_dim); layout plumbing on a few KiB only.
    return out_t[:, :B].T


def init_proxy_params(key, x_dim, hidden_dim, output_dim, dtype=jnp.float32):
    """Deterministic synthetic init in PyTorch Linear layout: W (out, in), b (out,)."""
    ks = jax.random.split(key, 6)

    def lin(kw, kb, fan_in, fan_out):
        bound = 1.0 / float(fan_in) ** 0.5
        w = jax.random.uniform(kw, (fan_out, fan_in), dtype, -bound, bound)
        b = jax.random.uniform(kb, (fan_out,), dtype, -bound, bound)
        return w, b

    w0, b0 = lin(ks[0], ks[1], x_dim, hidden_dim)
    w1, b1 = lin(ks[2], ks[3], hidden_dim, hidden_dim)
    w2, b2 = lin(ks[4], ks[5], hidden_dim, output_dim)
    return (w0, b0, w1, b1, w2, b2)


def _ref_forward(x, params, act):
    # Pure-JAX f32 reference of the Proxy forward with a pluggable activation.
    w0, b0, w1, b1, w2, b2 = params
    h = act(x @ w0.T + b0)
    h = act(h @ w1.T + b1)
    return h @ w2.T + b2


if __name__ == "__main__":
    # Small shapes consistent with the module: Proxy(x_dim=32, hidden_dim=128,
    # num_hidden_layers=1, output_dim=1).
    X_DIM, HIDDEN, OUT = 32, 128, 1

    key = jax.random.PRNGKey(0)
    kx, kp = jax.random.split(key)
    params = init_proxy_params(kp, X_DIM, HIDDEN, OUT)
    prepared = prepare_proxy_params(params)   # bf16 weights cast ONCE

    fwd = jax.jit(proxy_forward)

    # B=512 exercises the large-batch path (2 parallel tiles on v7x, single
    # tile elsewhere); B=8 exercises the pad-to-128-lanes small-batch path.
    for B in (512, 8):
        x = jax.random.normal(jax.random.fold_in(kx, B), (B, X_DIM), jnp.float32)
        y = jax.block_until_ready(fwd(x, prepared))
        assert y.shape == (B, OUT)

        # Tight check vs an f32 reference using the SAME sigmoid-form GELU:
        # the only difference is bf16 matmul-input rounding.
        y_same = _ref_forward(x, params, _gelu_sigmoid)
        err_same = jnp.max(jnp.abs(y - y_same))
        assert jnp.allclose(y, y_same, atol=3e-2, rtol=3e-2), (
            f"B={B}: max|diff| vs matching-GELU ref = {err_same}")

        # Loose check vs the exact-erf GELU used by torch.nn.GELU(); the
        # sigmoid-GELU approximation delta was accepted in review.
        y_exact = _ref_forward(x, params,
                               lambda v: jax.nn.gelu(v, approximate=False))
        err_exact = jnp.max(jnp.abs(y - y_exact))
        assert jnp.allclose(y, y_exact, atol=1e-1, rtol=1e-1), (
            f"B={B}: max|diff| vs exact-GELU ref = {err_exact}")

    print("KERNEL_OK")
</pallas_src>

<mosaic_0001>
module attributes {stable_mosaic.version = 11 : i64} {
  func.func @proxy_mlp_kernel(%arg0: i32, %arg1: memref<512x32xf32, #tpu.memory_space<vmem>>, %arg2: memref<128x32xbf16, #tpu.memory_space<vmem>>, %arg3: memref<128x1xf32, #tpu.memory_space<vmem>>, %arg4: memref<128x128xbf16, #tpu.memory_space<vmem>>, %arg5: memref<128x1xf32, #tpu.memory_space<vmem>>, %arg6: memref<1x128xbf16, #tpu.memory_space<vmem>>, %arg7: memref<1x1xf32, #tpu.memory_space<vmem>>, %arg8: memref<1x512xf32, #tpu.memory_space<vmem>>) attributes {dimension_semantics = [#tpu.dimension_semantics<parallel>], iteration_bounds = array<i64: 1>, scalar_prefetch = 0 : i64, scratch_operands = 0 : i64, tpu.core_type = #tpu.core_type<tc>, window_params = [{transform_indices = @transform_0, window_bounds = array<i64: 512, 32>}, {pipeline_mode = #tpu.pipeline_mode<synchronous>, transform_indices = @transform_1, window_bounds = array<i64: 128, 32>}, {pipeline_mode = #tpu.pipeline_mode<synchronous>, transform_indices = @transform_2, window_bounds = array<i64: 128, 1>}, {pipeline_mode = #tpu.pipeline_mode<synchronous>, transform_indices = @transform_3, window_bounds = array<i64: 128, 128>}, {pipeline_mode = #tpu.pipeline_mode<synchronous>, transform_indices = @transform_4, window_bounds = array<i64: 128, 1>}, {pipeline_mode = #tpu.pipeline_mode<synchronous>, transform_indices = @transform_5, window_bounds = array<i64: 1, 128>}, {pipeline_mode = #tpu.pipeline_mode<synchronous>, transform_indices = @transform_6, window_bounds = array<i64: 1, 1>}, {transform_indices = @transform_7, window_bounds = array<i64: 1, 512>}]} {
    %c0 = arith.constant 0 : index
    %c0_0 = arith.constant 0 : index
    %0 = vector.load %arg1[%c0, %c0_0] : memref<512x32xf32, #tpu.memory_space<vmem>>, vector<512x32xf32>
    %1 = arith.truncf %0 : vector<512x32xf32> to vector<512x32xbf16>
    %c0_1 = arith.constant 0 : index
    %c0_2 = arith.constant 0 : index
    %2 = vector.load %arg2[%c0_1, %c0_2] : memref<128x32xbf16, #tpu.memory_space<vmem>>, vector<128x32xbf16>
    %cst = arith.constant dense<0.000000e+00> : vector<128x512xf32>
    %3 = tpu.matmul %2, %1, %cst {dimension_numbers = #tpu.dot_dimension_numbers<[1], [1], [0], [0], [0, 0, 1, 0], [], []>} : vector<128x32xbf16>, vector<512x32xbf16>, vector<128x512xf32> -> vector<128x512xf32>
    %c0_3 = arith.constant 0 : index
    %c0_4 = arith.constant 0 : index
    %4 = vector.load %arg3[%c0_3, %c0_4] : memref<128x1xf32, #tpu.memory_space<vmem>>, vector<128x1xf32>
    %5 = vector.broadcast %4 : vector<128x1xf32> to vector<128x512xf32>
    %6 = arith.addf %3, %5 : vector<128x512xf32>
    %cst_5 = arith.constant 5.000000e-01 : f32
    %7 = vector.broadcast %cst_5 : f32 to vector<128x512xf32>
    %8 = arith.mulf %7, %6 : vector<128x512xf32>
    %cst_6 = arith.constant 8.510000e-01 : f32
    %9 = vector.broadcast %cst_6 : f32 to vector<128x512xf32>
    %10 = arith.mulf %9, %6 : vector<128x512xf32>
    %11 = math.tanh %10 : vector<128x512xf32>
    %cst_7 = arith.constant 1.000000e+00 : f32
    %12 = vector.broadcast %cst_7 : f32 to vector<128x512xf32>
    %13 = arith.addf %12, %11 : vector<128x512xf32>
    %14 = arith.mulf %8, %13 : vector<128x512xf32>
    %c0_8 = arith.constant 0 : index
    %c0_9 = arith.constant 0 : index
    %15 = vector.load %arg4[%c0_8, %c0_9] : memref<128x128xbf16, #tpu.memory_space<vmem>>, vector<128x128xbf16>
    %16 = arith.truncf %14 : vector<128x512xf32> to vector<128x512xbf16>
    %cst_10 = arith.constant dense<0.000000e+00> : vector<128x512xf32>
    %17 = tpu.matmul %15, %16, %cst_10 {dimension_numbers = #tpu.dot_dimension_numbers<[1], [0], [0], [1], [0, 0, 1, 1], [], []>} : vector<128x128xbf16>, vector<128x512xbf16>, vector<128x512xf32> -> vector<128x512xf32>
    %c0_11 = arith.constant 0 : index
    %c0_12 = arith.constant 0 : index
    %18 = vector.load %arg5[%c0_11, %c0_12] : memref<128x1xf32, #tpu.memory_space<vmem>>, vector<128x1xf32>
    %19 = vector.broadcast %18 : vector<128x1xf32> to vector<128x512xf32>
    %20 = arith.addf %17, %19 : vector<128x512xf32>
    %cst_13 = arith.constant 5.000000e-01 : f32
    %21 = vector.broadcast %cst_13 : f32 to vector<128x512xf32>
    %22 = arith.mulf %21, %20 : vector<128x512xf32>
    %cst_14 = arith.constant 8.510000e-01 : f32
    %23 = vector.broadcast %cst_14 : f32 to vector<128x512xf32>
    %24 = arith.mulf %23, %20 : vector<128x512xf32>
    %25 = math.tanh %24 : vector<128x512xf32>
    %cst_15 = arith.constant 1.000000e+00 : f32
    %26 = vector.broadcast %cst_15 : f32 to vector<128x512xf32>
    %27 = arith.addf %26, %25 : vector<128x512xf32>
    %28 = arith.mulf %22, %27 : vector<128x512xf32>
    %c0_16 = arith.constant 0 : index
    %c0_17 = arith.constant 0 : index
    %29 = vector.load %arg6[%c0_16, %c0_17] : memref<1x128xbf16, #tpu.memory_space<vmem>>, vector<1x128xbf16>
    %30 = arith.truncf %28 : vector<128x512xf32> to vector<128x512xbf16>
    %cst_18 = arith.constant dense<0.000000e+00> : vector<1x512xf32>
    %31 = tpu.matmul %29, %30, %cst_18 {dimension_numbers = #tpu.dot_dimension_numbers<[1], [0], [0], [1], [0, 0, 1, 1], [], []>} : vector<1x128xbf16>, vector<128x512xbf16>, vector<1x512xf32> -> vector<1x512xf32>
    %c0_19 = arith.constant 0 : index
    %c0_20 = arith.constant 0 : index
    %32 = vector.load %arg7[%c0_19, %c0_20] : memref<1x1xf32, #tpu.memory_space<vmem>>, vector<1x1xf32>
    %33 = vector.broadcast %32 : vector<1x1xf32> to vector<1x512xf32>
    %34 = arith.addf %31, %33 : vector<1x512xf32>
    %c0_21 = arith.constant 0 : index
    %c0_22 = arith.constant 0 : index
    %35 = vector.load %arg8[%c0_21, %c0_22] : memref<1x512xf32, #tpu.memory_space<vmem>>, vector<1x512xf32>
    tpu.vector_store %arg8[%c0_21, %c0_22], %34 {strides = array<i32>} : memref<1x512xf32, #tpu.memory_space<vmem>>, vector<1x512xf32>,
    return
  }
  func.func @transform_0(%arg0: i32) -> (i32, i32) {
    %c0_i32 = arith.constant 0 : i32
    %c0_i32_0 = arith.constant 0 : i32
    return %arg0, %c0_i32 : i32, i32
  }
  func.func @transform_1(%arg0: i32) -> (i32, i32) {
    %c0_i32 = arith.constant 0 : i32
    %c0_i32_0 = arith.constant 0 : i32
    %c0_i32_1 = arith.constant 0 : i32
    return %c0_i32, %c0_i32_0 : i32, i32
  }
  func.func @transform_2(%arg0: i32) -> (i32, i32) {
    %c0_i32 = arith.constant 0 : i32
    %c0_i32_0 = arith.constant 0 : i32
    %c0_i32_1 = arith.constant 0 : i32
    return %c0_i32, %c0_i32_0 : i32, i32
  }
  func.func @transform_3(%arg0: i32) -> (i32, i32) {
    %c0_i32 = arith.constant 0 : i32
    %c0_i32_0 = arith.constant 0 : i32
    %c0_i32_1 = arith.constant 0 : i32
    return %c0_i32, %c0_i32_0 : i32, i32
  }
  func.func @transform_4(%arg0: i32) -> (i32, i32) {
    %c0_i32 = arith.constant 0 : i32
    %c0_i32_0 = arith.constant 0 : i32
    %c0_i32_1 = arith.constant 0 : i32
    return %c0_i32, %c0_i32_0 : i32, i32
  }
  func.func @transform_5(%arg0: i32) -> (i32, i32) {
    %c0_i32 = arith.constant 0 : i32
    %c0_i32_0 = arith.constant 0 : i32
    %c0_i32_1 = arith.constant 0 : i32
    return %c0_i32, %c0_i32_0 : i32, i32
  }
  func.func @transform_6(%arg0: i32) -> (i32, i32) {
    %c0_i32 = arith.constant 0 : i32
    %c0_i32_0 = arith.constant 0 : i32
    %c0_i32_1 = arith.constant 0 : i32
    return %c0_i32, %c0_i32_0 : i32, i32
  }
  func.func @transform_7(%arg0: i32) -> (i32, i32) {
    %c0_i32 = arith.constant 0 : i32
    %c0_i32_0 = arith.constant 0 : i32
    return %c0_i32, %arg0 : i32, i32
  }
}

</mosaic_0001>

<bundles_post_ra>
// kernel: proxy_forward.1
= control target key start
LH: loop header
LB: loop body
LE: loop exit
PB: predicated region body
PF: predicated region fallthrough
CT: control target
= control target key end

     0   :  { %s3656_s0 = inlined_call_operand.vmem [shape: f32[512,32], index: 0, kind: input, shape index: {}]   ;;  %s3657_s1 = inlined_call_operand.vmem [shape: bf16[128,32], index: 1, kind: input, shape index: {}]   ;;  %s3658_s2 = inlined_call_operand.vmem [shape: f32[128,1], index: 2, kind: input, shape index: {}]   ;;  %s3659_s3 = inlined_call_operand.vmem [shape: bf16[128,128], index: 3, kind: input, shape index: {}]   ;;  %s3660_s4 = inlined_call_operand.vmem [shape: f32[128,1], index: 4, kind: input, shape index: {}]   ;;  %s3661_s5 = inlined_call_operand.vmem [shape: bf16[1,128], index: 5, kind: input, shape index: {}]   ;;  %s3662_s6 = inlined_call_operand.<no memory space> [shape: f32[1,1], index: 6, kind: input, shape index: {}]   ;;  %s3663_s7 = inlined_call_operand.hbm [shape: f32[1,512], index: 7, kind: output, shape index: {}]  }
   0x1   :  { %v12_v0 = vstv %s3662_s6 }
   0x2   :  { %13 = vst [vmem:[#allocation2] sm:$0x1] %v12_v0 }
   0x3   :  { %v46_v1 = vld [vmem:[%s3656_s0 + $0x80] sm:$0xff]  ;;  %v47_v2 = vld [vmem:[%s3656_s0 + $0x88] sm:$0xff]  ;;  %vm278_vm0 = vcmask 261120   ;;  %v3664_v8 = vmov 0   ;;  %v48_v13 = vld [vmem:[%s3656_s0 + $0x90] sm:$0xff] }
   0x4   :  { %v78_v3 = vld [vmem:[%s3656_s0 + $0x180] sm:$0xff]  ;;  %v102_v4 = vpack.c.bf16 %v47_v2, %v46_v1  ;;  %v79_v5 = vld [vmem:[%s3656_s0 + $0x188] sm:$0xff]  ;;  %1971 = vset.pattern.permute.xlu0 %v3664_v8  ;;  %1972 = vset.pattern.permute.xlu1 %v3664_v8  ;;  %v49_v15 = vld [vmem:[%s3656_s0 + $0x98] sm:$0xff] }
   0x5   :  { %v30_v6 = vld [vmem:[%s3656_s0] sm:$0xff]  ;;  %v31_v7 = vld [vmem:[%s3656_s0 + $0x8] sm:$0xff]  ;;  %v118_v9 = vpack.c.bf16 %v79_v5, %v78_v3  ;;  %v80_v16 = vld [vmem:[%s3656_s0 + $0x190] sm:$0xff]  ;;  %v103_v19 = vpack.c.bf16 %v49_v15, %v48_v13 }
   0x6   :  { %v94_v10 = vpack.c.bf16 %v31_v7, %v30_v6  ;;  %v62_v11 = vld [vmem:[%s3656_s0 + $0x100] sm:$0xff]  ;;  %v63_v12 = vld [vmem:[%s3656_s0 + $0x108] sm:$0xff]  ;;  %1952 = vmatprep.subr.msk.bf16.mxu0 %vm278_vm0, %v102_v4  ;;  %v81_v17 = vld [vmem:[%s3656_s0 + $0x198] sm:$0xff] }
   0x7   :  { %v110_v14 = vpack.c.bf16 %v63_v12, %v62_v11  ;;  %1960 = vmatprep.subr.msk.bf16.mxu1 %vm278_vm0, %v118_v9  ;;  %v119_v20 = vpack.c.bf16 %v81_v17, %v80_v16  ;;  %v32_v21 = vld [vmem:[%s3656_s0 + $0x10] sm:$0xff]  ;;  %v33_v22 = vld [vmem:[%s3656_s0 + $0x18] sm:$0xff]  ;;  %v50_v28 = vld [vmem:[%s3656_s0 + $0xa0] sm:$0xff] }
   0x8   :  { %v304_v18 = vsel %vm278_vm0, %v94_v10, 0  ;;  %v64_v23 = vld [vmem:[%s3656_s0 + $0x110] sm:$0xff]  ;;  %v65_v25 = vld [vmem:[%s3656_s0 + $0x118] sm:$0xff]  ;;  %v95_v26 = vpack.c.bf16 %v33_v22, %v32_v21  ;;  %v51_v29 = vld [vmem:[%s3656_s0 + $0xa8] sm:$0xff] }
   0x9   :  { %1889 = vmatpush3.bf16.xpose.msra.mxu0 %v304_v18  ;;  %v352_v24 = vsel %vm278_vm0, %v110_v14, 0  ;;  %v111_v27 = vpack.c.bf16 %v65_v25, %v64_v23  ;;  %v82_v30 = vld [vmem:[%s3656_s0 + $0x1a0] sm:$0xff]  ;;  %v83_v31 = vld [vmem:[%s3656_s0 + $0x1a8] sm:$0xff]  ;;  %v104_v33 = vpack.c.bf16 %v51_v29, %v50_v28  ;;  %v52_v42 = vld [vmem:[%s3656_s0 + $0xb0] sm:$0xff] }
   0xa   :  { %1921 = vmatpush3.bf16.xpose.msra.mxu1 %v352_v24  ;;  %1953 = vmatprep.subr.msk.bf16.mxu0 %vm278_vm0, %v103_v19  ;;  %v307_v32 = vsel %vm278_vm0, %v95_v26, 0  ;;  %v120_v35 = vpack.c.bf16 %v83_v31, %v82_v30  ;;  %v34_v36 = vld [vmem:[%s3656_s0 + $0x20] sm:$0xff]  ;;  %v35_v37 = vld [vmem:[%s3656_s0 + $0x28] sm:$0xff]  ;;  %v53_v43 = vld [vmem:[%s3656_s0 + $0xb8] sm:$0xff] }
   0xb   :  { %1961 = vmatprep.subr.msk.bf16.mxu1 %vm278_vm0, %v119_v20  ;;  %v355_v34 = vsel %vm278_vm0, %v111_v27, 0  ;;  %v66_v38 = vld [vmem:[%s3656_s0 + $0x120] sm:$0xff]  ;;  %v67_v39 = vld [vmem:[%s3656_s0 + $0x128] sm:$0xff]  ;;  %v96_v40 = vpack.c.bf16 %v35_v37, %v34_v36  ;;  %v84_v44 = vld [vmem:[%s3656_s0 + $0x1b0] sm:$0xff]  ;;  %v105_v47 = vpack.c.bf16 %v53_v43, %v52_v42 }
   0xc   :  { %v112_v41 = vpack.c.bf16 %v67_v39, %v66_v38  ;;  %v85_v45 = vld [vmem:[%s3656_s0 + $0x1b8] sm:$0xff]  ;;  %v36_v50 = vld [vmem:[%s3656_s0 + $0x30] sm:$0xff]  ;;  %v54_v54 = vld [vmem:[%s3656_s0 + $0xc0] sm:$0xff] }
   0xd   :  { %v310_v46 = vsel %vm278_vm0, %v96_v40, 0  ;;  %v121_v49 = vpack.c.bf16 %v85_v45, %v84_v44  ;;  %v37_v51 = vld [vmem:[%s3656_s0 + $0x38] sm:$0xff]  ;;  %v68_v52 = vld [vmem:[%s3656_s0 + $0x130] sm:$0xff]  ;;  %v2432_v56 = vld [vmem:[%s3657_s1] sm:$0xff]  }
   0xe   :  { %v358_v48 = vsel %vm278_vm0, %v112_v41, 0  ;;  %v69_v53 = vld [vmem:[%s3656_s0 + $0x138] sm:$0xff]  ;;  %v97_v55 = vpack.c.bf16 %v37_v51, %v36_v50  ;;  %v55_v58 = vld [vmem:[%s3656_s0 + $0xc8] sm:$0xff]  ;;  %v86_v59 = vld [vmem:[%s3656_s0 + $0x1c0] sm:$0xff]  ;;  %1904 = vmatprep.mubr.msk.bf16.mxu0 %vm278_vm0, %v2432_v56  ;;  %1936 = vmatprep.mubr.msk.bf16.mxu1 %vm278_vm0, %v2432_v56 }
   0xf   :  { %v113_v57 = vpack.c.bf16 %v69_v53, %v68_v52  ;;  %v87_v60 = vld [vmem:[%s3656_s0 + $0x1c8] sm:$0xff]  ;;  %v142_v61 = vld [vmem:[%s3658_s2] sm:$0xff]  ;;  %v106_v63 = vpack.c.bf16 %v55_v58, %v54_v54  ;;  %v144_v2 = vld [vmem:[%s3658_s2 + $0x10] sm:$0xff] }
  0x10   :  { %160 = vperm.xlu0 %1971, %v142_v61   ;;  %v313_v62 = vsel %vm278_vm0, %v97_v55, 0  ;;  %v38_v0 = vld [vmem:[%s3656_s0 + $0x40] sm:$0xff]  ;;  %v143_v1 = vld [vmem:[%s3658_s2 + $0x8] sm:$0xff]  ;;  %v122_v4 = vpack.c.bf16 %v87_v60, %v86_v59  ;;  %170 = vperm.xlu1 %1972, %v144_v2   ;;  %v145_v9 = vld [vmem:[%s3658_s2 + $0x18] sm:$0xff] }
  0x11   :  { %1891 = vmatpush3.bf16.xpose.msra.mxu0 %v307_v32  ;;  %v361_v3 = vsel %vm278_vm0, %v113_v57, 0  ;;  %v39_v5 = vld [vmem:[%s3656_s0 + $0x48] sm:$0xff]  ;;  %v70_v6 = vld [vmem:[%s3656_s0 + $0x140] sm:$0xff]  ;;  %v56_v10 = vld [vmem:[%s3656_s0 + $0xd0] sm:$0xff] }
  0x12   :  { %1923 = vmatpush3.bf16.xpose.msra.mxu1 %v355_v34  ;;  %1954 = vmatprep.subr.msk.bf16.mxu0 %vm278_vm0, %v104_v33  ;;  %v71_v7 = vld [vmem:[%s3656_s0 + $0x148] sm:$0xff]  ;;  %v98_v11 = vpack.c.bf16 %v39_v5, %v38_v0  ;;  %v57_v12 = vld [vmem:[%s3656_s0 + $0xd8] sm:$0xff]  ;;  %v88_v13 = vld [vmem:[%s3656_s0 + $0x1d0] sm:$0xff] }
  0x13   :  { %1962 = vmatprep.subr.msk.bf16.mxu1 %vm278_vm0, %v120_v35  ;;  %v146_v14 = vld [vmem:[%s3658_s2 + $0x20] sm:$0xff]  ;;  %v114_v15 = vpack.c.bf16 %v71_v7, %v70_v6  ;;  %v89_v16 = vld [vmem:[%s3656_s0 + $0x1d8] sm:$0xff]  ;;  %v40_v17 = vld [vmem:[%s3656_s0 + $0x50] sm:$0xff]  ;;  %v107_v23 = vpack.c.bf16 %v57_v12, %v56_v10 }
  0x14   :  { %165 = vperm.xlu0 %1971, %v143_v1   ;;  %175 = vperm.xlu1 %1972, %v145_v9   ;;  %v41_v18 = vld [vmem:[%s3656_s0 + $0x58] sm:$0xff]  ;;  %v147_v19 = vld [vmem:[%s3658_s2 + $0x28] sm:$0xff]  ;;  %v72_v20 = vld [vmem:[%s3656_s0 + $0x150] sm:$0xff]  ;;  %v316_v22 = vsel %vm278_vm0, %v98_v11, 0  ;;  %v123_v26 = vpack.c.bf16 %v89_v16, %v88_v13 }
  0x15   :  { %v73_v21 = vld [vmem:[%s3656_s0 + $0x158] sm:$0xff]  ;;  %v148_v24 = vld [vmem:[%s3658_s2 + $0x30] sm:$0xff]  ;;  %v364_v25 = vsel %vm278_vm0, %v114_v15, 0  ;;  %v99_v27 = vpack.c.bf16 %v41_v18, %v40_v17  ;;  %v58_v30 = vld [vmem:[%s3656_s0 + $0xe0] sm:$0xff] }
  0x16   :  { %v115_v28 = vpack.c.bf16 %v73_v21, %v72_v20  ;;  %v149_v29 = vld [vmem:[%s3658_s2 + $0x38] sm:$0xff]  ;;  %v150_v31 = vld [vmem:[%s3658_s2 + $0x40] sm:$0xff]  ;;  %v59_v33 = vld [vmem:[%s3656_s0 + $0xe8] sm:$0xff] }
  0x17   :  { %v319_v32 = vsel %vm278_vm0, %v99_v27, 0  ;;  %v90_v34 = vld [vmem:[%s3656_s0 + $0x1e0] sm:$0xff]  ;;  %v91_v35 = vld [vmem:[%s3656_s0 + $0x1e8] sm:$0xff]  ;;  %v152_v37 = vld [vmem:[%s3658_s2 + $0x50] sm:$0xff]  ;;  %v108_v41 = vpack.c.bf16 %v59_v33, %v58_v30 }
  0x18   :  { %180 = vperm.xlu0 %1971, %v146_v14   ;;  %185 = vperm.xlu1 %1972, %v147_v19   ;;  %v367_v36 = vsel %vm278_vm0, %v115_v28, 0  ;;  %v151_v38 = vld [vmem:[%s3658_s2 + $0x48] sm:$0xff]  ;;  %v42_v39 = vld [vmem:[%s3656_s0 + $0x60] sm:$0xff]  ;;  %v153_v44 = vld [vmem:[%s3658_s2 + $0x58] sm:$0xff]  ;;  %v124_v45 = vpack.c.bf16 %v91_v35, %v90_v34 }
  0x19   :  { %1893 = vmatpush3.bf16.xpose.msra.mxu0 %v310_v46  ;;  %v43_v40 = vld [vmem:[%s3656_s0 + $0x68] sm:$0xff]  ;;  %v74_v42 = vld [vmem:[%s3656_s0 + $0x160] sm:$0xff] }
  0x1a   :  { %1925 = vmatpush3.bf16.xpose.msra.mxu1 %v358_v48  ;;  %1955 = vmatprep.subr.msk.bf16.mxu0 %vm278_vm0, %v105_v47  ;;  %v75_v43 = vld [vmem:[%s3656_s0 + $0x168] sm:$0xff] }
  0x1b   :  { %1963 = vmatprep.subr.msk.bf16.mxu1 %vm278_vm0, %v121_v49 }
  0x1c   :  { %190 = vperm.xlu0 %1971, %v148_v24   ;;  %195 = vperm.xlu1 %1972, %v149_v29  }
  0x20   :  { %200 = vperm.xlu0 %1971, %v150_v31   ;;  %205 = vperm.xlu1 %1972, %v151_v38  }
  0x21   :  { %1895 = vmatpush3.bf16.xpose.msra.mxu0 %v313_v62 }
  0x22   :  { %1927 = vmatpush3.bf16.xpose.msra.mxu1 %v361_v3  ;;  %1956 = vmatprep.subr.msk.bf16.mxu0 %vm278_vm0, %v106_v63 }
  0x23   :  { %1964 = vmatprep.subr.msk.bf16.mxu1 %vm278_vm0, %v122_v4 }
  0x24   :  { %210 = vperm.xlu0 %1971, %v152_v37  }
  0x29   :  { %1897 = vmatpush3.bf16.xpose.msra.mxu0 %v316_v22 }
  0x2a   :  { %1929 = vmatpush3.bf16.xpose.msra.mxu1 %v364_v25  ;;  %1957 = vmatprep.subr.msk.bf16.mxu0 %vm278_vm0, %v107_v23 }
  0x2b   :  { %1965 = vmatprep.subr.msk.bf16.mxu1 %vm278_vm0, %v123_v26 }
  0x31   :  { %1899 = vmatpush3.bf16.xpose.msra.mxu0 %v319_v32 }
  0x32   :  { %14 = vsyncpa [#allocation4], 0  ;;  %1931 = vmatpush3.bf16.xpose.msra.mxu1 %v367_v36  ;;  %1958 = vmatprep.subr.msk.bf16.mxu0 %vm278_vm0, %v108_v41  ;;  %v100_v46 = vpack.c.bf16 %v43_v40, %v42_v39  ;;  %v154_v47 = vld [vmem:[%s3658_s2 + $0x60] sm:$0xff]  ;;  %v116_v48 = vpack.c.bf16 %v75_v43, %v74_v42  ;;  %v60_v49 = vld [vmem:[%s3656_s0 + $0xf0] sm:$0xff] }
  0x33   :  { %1966 = vmatprep.subr.msk.bf16.mxu1 %vm278_vm0, %v124_v45  ;;  %v61_v50 = vld [vmem:[%s3656_s0 + $0xf8] sm:$0xff]  ;;  %215 = vperm.xlu1 %1972, %v153_v44   ;;  %v92_v51 = vld [vmem:[%s3656_s0 + $0x1f0] sm:$0xff]  ;;  %v155_v53 = vld [vmem:[%s3658_s2 + $0x68] sm:$0xff] }
  0x34   :  { %v93_v52 = vld [vmem:[%s3656_s0 + $0x1f8] sm:$0xff]  ;;  %220 = vperm.xlu0 %1971, %v154_v47   ;;  %v322_v54 = vsel %vm278_vm0, %v100_v46, 0  ;;  %v109_v55 = vpack.c.bf16 %v61_v50, %v60_v49  ;;  %v156_v57 = vld [vmem:[%s3658_s2 + $0x70] sm:$0xff]  ;;  %v370_v58 = vsel %vm278_vm0, %v116_v48, 0  ;;  %v993_v2 = vld [vmem:[%s3660_s4] sm:$0xff] }
  0x35   :  { %v125_v59 = vpack.c.bf16 %v93_v52, %v92_v51  ;;  %v44_v60 = vld [vmem:[%s3656_s0 + $0x70] sm:$0xff]  ;;  %v45_v61 = vld [vmem:[%s3656_s0 + $0x78] sm:$0xff]  ;;  %v994_v4 = vld [vmem:[%s3660_s4 + $0x8] sm:$0xff] }
  0x36   :  { %v76_v62 = vld [vmem:[%s3656_s0 + $0x170] sm:$0xff]  ;;  %v77_v63 = vld [vmem:[%s3656_s0 + $0x178] sm:$0xff]  ;;  %v101_v1 = vpack.c.bf16 %v45_v61, %v44_v60  ;;  %v997_v10 = vld [vmem:[%s3660_s4 + $0x20] sm:$0xff] }
  0x37   :  { %225 = vperm.xlu1 %1972, %v155_v53   ;;  %v157_v0 = vld [vmem:[%s3658_s2 + $0x78] sm:$0xff]  ;;  %v117_v3 = vpack.c.bf16 %v77_v63, %v76_v62  ;;  %v995_v6 = vld [vmem:[%s3660_s4 + $0x10] sm:$0xff]  ;;  %v998_v11 = vld [vmem:[%s3660_s4 + $0x28] sm:$0xff] }
  0x38   :  { %230 = vperm.xlu0 %1971, %v156_v57   ;;  %v325_v5 = vsel %vm278_vm0, %v101_v1, 0  ;;  %v996_v9 = vld [vmem:[%s3660_s4 + $0x18] sm:$0xff]  ;;  %v1974_v12 = vld [vmem:[%s3657_s1 + $0x8] sm:$0xff]   ;;  %v999_v13 = vld [vmem:[%s3660_s4 + $0x30] sm:$0xff] }
  0x39   :  { %1901 = vmatpush3.bf16.xpose.msra.mxu0 %v322_v54  ;;  %v373_v7 = vsel %vm278_vm0, %v117_v3, 0  ;;  %v1000_v14 = vld [vmem:[%s3660_s4 + $0x38] sm:$0xff]  ;;  %v1001_v15 = vld [vmem:[%s3660_s4 + $0x40] sm:$0xff]  ;;  %v1002_v16 = vld [vmem:[%s3660_s4 + $0x48] sm:$0xff] }
  0x3a   :  { %1933 = vmatpush3.bf16.xpose.msra.mxu1 %v370_v58  ;;  %1959 = vmatprep.subr.msk.bf16.mxu0 %vm278_vm0, %v109_v55  ;;  %v1975_v17 = vld [vmem:[%s3657_s1 + $0x10] sm:$0xff]   ;;  %v1004_v18 = vld [vmem:[%s3660_s4 + $0x58] sm:$0xff]  ;;  %v1005_v19 = vld [vmem:[%s3660_s4 + $0x60] sm:$0xff] }
  0x3b   :  { %1967 = vmatprep.subr.msk.bf16.mxu1 %vm278_vm0, %v125_v59  ;;  %235 = vperm.xlu1 %1972, %v157_v0   ;;  %v1006_v20 = vld [vmem:[%s3660_s4 + $0x68] sm:$0xff]  ;;  %v1976_v21 = vld [vmem:[%s3657_s1 + $0x18] sm:$0xff]   ;;  %v1007_v22 = vld [vmem:[%s3660_s4 + $0x70] sm:$0xff] }
  0x3c   :  { %1011 = vperm.xlu0 %1971, %v993_v2   ;;  %v1008_v23 = vld [vmem:[%s3660_s4 + $0x78] sm:$0xff]  ;;  %v1716_v24 = vld [vmem:[#allocation2] sm:$0x1]  ;;  %v1978_v26 = vld [vmem:[%s3657_s1 + $0x28] sm:$0xff]  }
  0x3d   :  { %v1977_v25 = vld [vmem:[%s3657_s1 + $0x20] sm:$0xff]   ;;  %v1979_v27 = vld [vmem:[%s3657_s1 + $0x30] sm:$0xff]   ;;  %v1980_v28 = vld [vmem:[%s3657_s1 + $0x38] sm:$0xff]  }
  0x3f   :  { %1016 = vperm.xlu1 %1972, %v994_v4  }
  0x40   :  { %1021 = vperm.xlu0 %1971, %v995_v6  }
  0x41   :  { %1903 = vmatpush3.bf16.xpose.msra.mxu0 %v325_v5 }
  0x42   :  { %1935 = vmatpush3.bf16.xpose.msra.mxu1 %v373_v7 }
  0x43   :  { %1026 = vperm.xlu1 %1972, %v996_v9  }
  0x44   :  { %1031 = vperm.xlu0 %1971, %v997_v10  }
  0x47   :  { %1036 = vperm.xlu1 %1972, %v998_v11  }
  0x48   :  { %1905 = vmatmul.mubr.msk.bf16.vlgmr.msra.gmra.mrb[0].mxu0 %vm278_vm0, %v2432_v56  ;;  %1041 = vperm.xlu0 %1971, %v999_v13  }
  0x49   :  { %1937 = vmatmul.mubr.msk.bf16.vlgmr.msra.gmra.mrb[0].mxu1 %vm278_vm0, %v2432_v56  ;;  %1906 = vmatprep.mubr.msk.bf16.mxu0 %vm278_vm0, %v1974_v12  ;;  %v1003_v56 = vld [vmem:[%s3660_s4 + $0x50] sm:$0xff] }
  0x4a   :  { %1938 = vmatprep.mubr.msk.bf16.mxu1 %vm278_vm0, %v1974_v12 }
  0x4b   :  { %1046 = vperm.xlu1 %1972, %v1000_v14  }
  0x4c   :  { %1051 = vperm.xlu0 %1971, %v1001_v15  }
  0x4f   :  { %1056 = vperm.xlu1 %1972, %v1002_v16  }
  0x50   :  { %1907 = vmatmul.mubr.msk.bf16.gmra.mrb[4].mxu0 %vm278_vm0, %v1974_v12  ;;  %1061 = vperm.xlu0 %1971, %v1003_v56  }
  0x51   :  { %1939 = vmatmul.mubr.msk.bf16.gmra.mrb[4].mxu1 %vm278_vm0, %v1974_v12  ;;  %1908 = vmatprep.mubr.msk.bf16.mxu0 %vm278_vm0, %v1975_v17 }
  0x52   :  { %1940 = vmatprep.mubr.msk.bf16.mxu1 %vm278_vm0, %v1975_v17 }
  0x53   :  { %1066 = vperm.xlu1 %1972, %v1004_v18  }
  0x54   :  { %1071 = vperm.xlu0 %1971, %v1005_v19  }
  0x57   :  { %1076 = vperm.xlu1 %1972, %v1006_v20  }
  0x58   :  { %1909 = vmatmul.mubr.msk.bf16.gmra.mrb[8].mxu0 %vm278_vm0, %v1975_v17  ;;  %1081 = vperm.xlu0 %1971, %v1007_v22  }
  0x59   :  { %1941 = vmatmul.mubr.msk.bf16.gmra.mrb[8].mxu1 %vm278_vm0, %v1975_v17  ;;  %1910 = vmatprep.mubr.msk.bf16.mxu0 %vm278_vm0, %v1976_v21 }
  0x5a   :  { %1942 = vmatprep.mubr.msk.bf16.mxu1 %vm278_vm0, %v1976_v21 }
  0x5b   :  { %1086 = vperm.xlu1 %1972, %v1008_v23  }
  0x5c   :  { %1719 = vperm.xlu0 %1971, %v1716_v24  }
  0x60   :  { %1911 = vmatmul.mubr.msk.bf16.gmra.mrb[12].mxu0 %vm278_vm0, %v1976_v21 }
  0x61   :  { %1943 = vmatmul.mubr.msk.bf16.gmra.mrb[12].mxu1 %vm278_vm0, %v1976_v21  ;;  %1912 = vmatprep.mubr.msk.bf16.mxu0 %vm278_vm0, %v1977_v25 }
  0x62   :  { %1944 = vmatprep.mubr.msk.bf16.mxu1 %vm278_vm0, %v1977_v25 }
  0x68   :  { %1913 = vmatmul.mubr.msk.bf16.gmra.mrb[16].mxu0 %vm278_vm0, %v1977_v25 }
  0x69   :  { %1945 = vmatmul.mubr.msk.bf16.gmra.mrb[16].mxu1 %vm278_vm0, %v1977_v25  ;;  %1914 = vmatprep.mubr.msk.bf16.mxu0 %vm278_vm0, %v1978_v26 }
  0x6a   :  { %1946 = vmatprep.mubr.msk.bf16.mxu1 %vm278_vm0, %v1978_v26 }
  0x70   :  { %1915 = vmatmul.mubr.msk.bf16.gmra.mrb[20].mxu0 %vm278_vm0, %v1978_v26 }
  0x71   :  { %1947 = vmatmul.mubr.msk.bf16.gmra.mrb[20].mxu1 %vm278_vm0, %v1978_v26  ;;  %1916 = vmatprep.mubr.msk.bf16.mxu0 %vm278_vm0, %v1979_v27 }
  0x72   :  { %1948 = vmatprep.mubr.msk.bf16.mxu1 %vm278_vm0, %v1979_v27 }
  0x78   :  { %1917 = vmatmul.mubr.msk.bf16.gmra.mrb[24].mxu0 %vm278_vm0, %v1979_v27 }
  0x79   :  { %1949 = vmatmul.mubr.msk.bf16.gmra.mrb[24].mxu1 %vm278_vm0, %v1979_v27  ;;  %1918 = vmatprep.mubr.msk.bf16.mxu0 %vm278_vm0, %v1980_v28 }
  0x7a   :  { %1950 = vmatprep.mubr.msk.bf16.mxu1 %vm278_vm0, %v1980_v28 }
  0x80   :  { %1919 = vmatmul.mubr.msk.bf16.gmra.mrb[28].mxu0 %vm278_vm0, %v1980_v28 }
  0x81   :  { %1951 = vmatmul.mubr.msk.bf16.gmra.mrb[28].mxu1 %vm278_vm0, %v1980_v28  ;;  %1169 = vmatprep.mubr.bf16.mxu0 %v3664_v8 }
  0x82   :  { %1282 = vmatprep.mubr.bf16.mxu1 %v3664_v8 }
  0x8f   :  { %v161_v29 = vpop.permute.xlu0 %160  ;;  %v171_v51 = vpop.permute.xlu1 %170 }
  0x93   :  { %v166_v30 = vpop.permute.xlu0 %165  ;;  %v176_v9 = vpop.permute.xlu1 %175 }
 0x11b   :  { %v433_v31 = vpop.f32.mrb[0].mxu0 }
 0x11c   :  { %v434_v32 = vadd.f32 %v433_v31, %v161_v29  ;;  %v546_v33 = vpop.f32.mrb[0].mxu1  ;;  %v435_v34 = vpop.f32.mrb[1].mxu0 }
 0x11d   :  { %v547_v35 = vadd.f32 %v546_v33, %v161_v29  ;;  %v436_v36 = vadd.f32 %v435_v34, %v161_v29  ;;  %v548_v37 = vpop.f32.mrb[1].mxu1  ;;  %v437_v38 = vpop.f32.mrb[2].mxu0 }
 0x11e   :  { %v689_v39 = vmul.f32 0.851, %v434_v32  ;;  %v549_v40 = vadd.f32 %v548_v37, %v161_v29  ;;  %v438_v41 = vadd.f32 %v437_v38, %v166_v30  ;;  %v550_v42 = vpop.f32.mrb[2].mxu1  ;;  %v439_v43 = vpop.f32.mrb[3].mxu0  ;;  %v625_v3 = vmul.f32 0.5, %v434_v32 }
 0x11f   :  { %v691_v44 = vmul.f32 0.851, %v547_v35  ;;  %v690_v45 = vmul.f32 0.851, %v436_v36  ;;  %v552_v47 = vpop.f32.mrb[3].mxu1  ;;  %v551_v49 = vadd.f32 %v550_v42, %v166_v30  ;;  %v440_v50 = vadd.f32 %v439_v43, %v166_v30  ;;  %v181_v43 = vpop.permute.xlu0 %180 }
 0x120   :  { %1989 = vtanh.f32 %v689_v39  ;;  %v692_v46 = vmul.f32 0.851, %v549_v40  ;;  %v693_v48 = vmul.f32 0.851, %v438_v41  ;;  %v553_v52 = vadd.f32 %v552_v47, %v166_v30 }
 0x121   :  { %1991 = vtanh.f32 %v691_v44  ;;  %v695_v53 = vmul.f32 0.851, %v551_v49  ;;  %v694_v55 = vmul.f32 0.851, %v440_v50  ;;  %v2701_v4 = vmul.f32 0.5, %v547_v35 }
 0x122   :  { %1993 = vtanh.f32 %v690_v45  ;;  %v696_v57 = vmul.f32 0.851, %v553_v52  ;;  %v2703_v10 = vmul.f32 0.5, %v436_v36  ;;  %v2705_v17 = vmul.f32 0.5, %v549_v40 }
 0x123   :  { %1995 = vtanh.f32 %v692_v46  ;;  %v443_v54 = vpop.f32.mrb[4].mxu0  ;;  %v629_v56 = vmul.f32 0.5, %v438_v41  ;;  %v631_v20 = vmul.f32 0.5, %v551_v49  ;;  %v2709_v26 = vmul.f32 0.5, %v440_v50 }
 0x124   :  { %1997 = vtanh.f32 %v693_v48  ;;  %v556_v58 = vpop.f32.mrb[4].mxu1  ;;  %v444_v59 = vadd.f32 %v443_v54, %v171_v51  ;;  %v445_v61 = vpop.f32.mrb[5].mxu0  ;;  %v2711_v31 = vmul.f32 0.5, %v553_v52 }
 0x125   :  { %1999 = vtanh.f32 %v695_v53  ;;  %v557_v60 = vadd.f32 %v556_v58, %v171_v51  ;;  %v558_v62 = vpop.f32.mrb[5].mxu1  ;;  %v446_v63 = vadd.f32 %v445_v61, %v171_v51  ;;  %v447_v1 = vpop.f32.mrb[6].mxu0 }
 0x126   :  { %v559_v0 = vadd.f32 %v558_v62, %v171_v51  ;;  %v560_v2 = vpop.f32.mrb[6].mxu1  ;;  %2001 = vtanh.f32 %v694_v55  ;;  %v697_v5 = vmul.f32 0.851, %v444_v59  ;;  %v449_v6 = vpop.f32.mrb[7].mxu0  ;;  %v448_v14 = vadd.f32 %v447_v1, %v176_v9 }
 0x127   :  { %v562_v7 = vpop.f32.mrb[7].mxu1  ;;  %2003 = vtanh.f32 %v696_v57  ;;  %v699_v11 = vmul.f32 0.851, %v557_v60  ;;  %v698_v12 = vmul.f32 0.851, %v446_v63  ;;  %v561_v15 = vadd.f32 %v560_v2, %v176_v9 }
 0x128   :  { %2005 = vtanh.f32 %v697_v5  ;;  %v700_v13 = vmul.f32 0.851, %v559_v0  ;;  %v450_v18 = vadd.f32 %v449_v6, %v176_v9  ;;  %v701_v21 = vmul.f32 0.851, %v448_v14 }
 0x129   :  { %2007 = vtanh.f32 %v699_v11  ;;  %v2707_v22 = vadd.f32 %v562_v7, %v176_v9  ;;  %v703_v27 = vmul.f32 0.851, %v561_v15  ;;  %v2713_v32 = vmul.f32 0.5, %v444_v59 }
 0x12a   :  { %v1990_v16 = vpop.eup %1989  ;;  %2009 = vtanh.f32 %v698_v12  ;;  %v2715_v33 = vmul.f32 0.5, %v557_v60  ;;  %v2717_v38 = vmul.f32 0.5, %v446_v63  ;;  %v702_v39 = vmul.f32 0.851, %v450_v18 }
 0x12b   :  { %v1992_v19 = vpop.eup %1991  ;;  %v453_v23 = vpop.f32.mrb[8].mxu0  ;;  %v817_v25 = vadd.f32 1.0, %v1990_v16  ;;  %2011 = vtanh.f32 %v700_v13  ;;  %v2721_v45 = vmul.f32 0.5, %v559_v0  ;;  %v637_v46 = vmul.f32 0.5, %v448_v14 }
 0x12c   :  { %v1994_v24 = vpop.eup %1993  ;;  %v566_v28 = vpop.f32.mrb[8].mxu1  ;;  %2013 = vtanh.f32 %v701_v21  ;;  %v819_v37 = vadd.f32 1.0, %v1992_v19  ;;  %v704_v47 = vmul.f32 0.851, %v2707_v22  ;;  %v639_v51 = vmul.f32 0.5, %v561_v15 }
 0x12d   :  { %v455_v29 = vpop.f32.mrb[9].mxu0  ;;  %v1996_v30 = vpop.eup %1995  ;;  %2015 = vtanh.f32 %v703_v27  ;;  %v2726_v49 = vmul.f32 %v817_v25, %v625_v3  ;;  %v454_v52 = vadd.f32 %v453_v23, %v181_v43  ;;  %v818_v54 = vadd.f32 1.0, %v1994_v24 }
 0x12e   :  { %v568_v34 = vpop.f32.mrb[9].mxu1  ;;  %v457_v35 = vpop.f32.mrb[10].mxu0  ;;  %2017 = vtanh.f32 %v702_v39  ;;  %v567_v57 = vadd.f32 %v566_v28, %v181_v43  ;;  %v2731_v59 = vmul.f32 %v819_v37, %v2701_v4  ;;  %v820_v60 = vadd.f32 1.0, %v1996_v30 }
 0x12f   :  { %v1998_v36 = vpop.eup %1997  ;;  %v570_v40 = vpop.f32.mrb[10].mxu1  ;;  %v705_v62 = vmul.f32 0.851, %v454_v52  ;;  %v2737_v2 = vmul.f32 0.5, %v450_v18  ;;  %2019 = vtanh.f32 %v704_v47  ;;  %v456_v15 = vadd.f32 %v455_v29, %v181_v43 }
 0x130   :  { %v2719_v41 = vpop.f32.mrb[11].mxu0  ;;  %v2000_v42 = vpop.eup %1999  ;;  %v821_v44 = vadd.f32 1.0, %v1998_v36  ;;  %v707_v3 = vmul.f32 0.851, %v567_v57  ;;  %v569_v16 = vadd.f32 %v568_v34, %v181_v43  ;;  %v2755_v21 = vmul.f32 %v820_v60, %v2705_v17 }
 0x131   :  { %v2724_v48 = vpop.f32.mrb[11].mxu1  ;;  %v823_v50 = vadd.f32 1.0, %v2000_v42  ;;  %v2002_v53 = vpop.eup %2001  ;;  %2021 = vtanh.f32 %v705_v62  ;;  %v2758_v23 = vmul.f32 0.5, %v2707_v22  ;;  %v2764_v30 = vmul.f32 0.5, %v454_v52 }
 0x132   :  { %v2728_v55 = vmul.f32 %v821_v44, %v629_v56  ;;  %v2004_v58 = vpop.eup %2003  ;;  %v186_v0 = vpop.permute.xlu1 %185  ;;  %v822_v7 = vadd.f32 1.0, %v2002_v53  ;;  %2023 = vtanh.f32 %v707_v3  ;;  %v706_v34 = vmul.f32 0.851, %v456_v15 }
 0x133   :  { %v2733_v61 = vmul.f32 %v823_v50, %v631_v20  ;;  %v2006_v63 = vpop.eup %2005  ;;  %v2739_v5 = vpop.f32.mrb[12].mxu0  ;;  %v2752_v20 = vmul.f32 %v818_v54, %v2703_v10  ;;  %v458_v24 = vadd.f32 %v457_v35, %v186_v0  ;;  %v824_v29 = vadd.f32 1.0, %v2004_v58 }
 0x134   :  { %v961_v1 = vpack.c.bf16 %v2728_v55, %v2726_v49  ;;  %v2008_v6 = vpop.eup %2007  ;;  %v825_v9 = vadd.f32 1.0, %v2006_v63  ;;  %v2743_v11 = vpop.f32.mrb[12].mxu1  ;;  %v571_v36 = vadd.f32 %v570_v40, %v186_v0  ;;  %v886_v17 = vmul.f32 %v822_v7, %v2709_v26 }
 0x135   :  { %v963_v4 = vpack.c.bf16 %v2733_v61, %v2731_v59  ;;  %v2745_v12 = vpop.f32.mrb[13].mxu0  ;;  %v2010_v13 = vpop.eup %2009  ;;  %v827_v14 = vadd.f32 1.0, %v2008_v6  ;;  %v2769_v42 = vmul.f32 0.5, %v567_v57  ;;  %v708_v22 = vmul.f32 0.851, %v569_v16 }
 0x136   :  { %v2747_v56 = vpop.f32.mrb[13].mxu1  ;;  %v2749_v18 = vpop.f32.mrb[14].mxu0  ;;  %v2772_v35 = vmul.f32 %v825_v9, %v2713_v32  ;;  %v826_v44 = vadd.f32 1.0, %v2010_v13  ;;  %2025 = vtanh.f32 %v706_v34  ;;  %v709_v40 = vmul.f32 0.851, %v458_v24 }
 0x137   :  { %v2012_v19 = vpop.eup %2011  ;;  %v2760_v25 = vpop.f32.mrb[14].mxu1  ;;  %v2775_v43 = vmul.f32 %v827_v14, %v2715_v33  ;;  %2027 = vtanh.f32 %v708_v22  ;;  %v711_v26 = vmul.f32 0.851, %v571_v36  ;;  %v460_v57 = vadd.f32 %v2719_v41, %v186_v0 }
 0x138   :  { %v2762_v27 = vpop.f32.mrb[15].mxu0  ;;  %v2014_v28 = vpop.eup %2013  ;;  %v828_v50 = vadd.f32 1.0, %v2012_v19  ;;  %v2785_v32 = vmul.f32 %v824_v29, %v2711_v31  ;;  %2029 = vtanh.f32 %v709_v40  ;;  %v2796_v41 = vmul.f32 0.5, %v456_v15 }
 0x139   :  { %v2766_v37 = vpop.f32.mrb[15].mxu1  ;;  %v2016_v10 = vpop.eup %2015  ;;  %v829_v39 = vadd.f32 1.0, %v2014_v28  ;;  %v2798_v3 = vmul.f32 0.5, %v569_v16  ;;  %2031 = vtanh.f32 %v711_v26  ;;  %v710_v13 = vmul.f32 0.851, %v460_v57 }
 0x13a   :  { %v831_v47 = vadd.f32 1.0, %v2016_v10  ;;  %v2018_v53 = vpop.eup %2017  ;;  %v191_v9 = vpop.permute.xlu0 %190  ;;  %v2810_v15 = vmul.f32 %v828_v50, %v2721_v45  ;;  %v647_v50 = vmul.f32 0.5, %v571_v36  ;;  %v2828_v26 = vmul.f32 0.5, %v460_v57 }
 0x13b   :  { %v2777_v52 = vmul.f32 %v829_v39, %v637_v46  ;;  %v2782_v58 = vpop.f32.mrb[16].mxu0  ;;  %v573_v46 = vadd.f32 %v2724_v48, %v186_v0  ;;  %v2805_v48 = vmul.f32 %v826_v44, %v2717_v38  ;;  %v830_v0 = vadd.f32 1.0, %v2018_v53  ;;  %v196_v53 = vpop.permute.xlu1 %195 }
 0x13c   :  { %v2779_v54 = vmul.f32 %v831_v47, %v639_v51  ;;  %v2790_v60 = vpop.f32.mrb[16].mxu1  ;;  %v2792_v62 = vpop.f32.mrb[17].mxu0  ;;  %v464_v16 = vadd.f32 %v2739_v5, %v191_v9  ;;  %v577_v29 = vadd.f32 %v2743_v11, %v191_v9  ;;  %v2815_v34 = vadd.f32 %v2745_v12, %v191_v9 }
 0x13d   :  { %v2020_v51 = vpop.eup %2019  ;;  %v2800_v31 = vpop.f32.mrb[17].mxu1  ;;  %v712_v14 = vmul.f32 0.851, %v573_v46  ;;  %2033 = vtanh.f32 %v710_v13  ;;  %v2822_v22 = vadd.f32 %v2747_v56, %v191_v9  ;;  %v962_v44 = vpack.c.bf16 %v886_v17, %v2752_v20 }
 0x13e   :  { %v2802_v6 = vpop.f32.mrb[18].mxu0  ;;  %v2022_v7 = vpop.eup %2021  ;;  %v832_v39 = vadd.f32 1.0, %v2020_v51  ;;  %v645_v47 = vmul.f32 0.5, %v458_v24  ;;  %v713_v5 = vmul.f32 0.851, %v464_v16  ;;  %v2826_v11 = vmul.f32 %v830_v0, %v2737_v2 }
 0x13f   :  { %v2807_v19 = vpop.f32.mrb[18].mxu1  ;;  %v2024_v28 = vpop.eup %2023  ;;  %v833_v45 = vadd.f32 1.0, %v2022_v7  ;;  %2035 = vtanh.f32 %v712_v14  ;;  %v715_v40 = vmul.f32 0.851, %v577_v29  ;;  %1137 = vmatprep.subr.bf16.mxu0 %v962_v44  ;;  %v714_v56 = vmul.f32 0.851, %v2815_v34 }
 0x140   :  { %v2817_v10 = vpop.f32.mrb[19].mxu0  ;;  %v2819_v38 = vpop.f32.mrb[19].mxu1  ;;  %v835_v12 = vadd.f32 1.0, %v2024_v28  ;;  %2037 = vtanh.f32 %v713_v5  ;;  %v716_v51 = vmul.f32 0.851, %v2822_v22  ;;  %1138 = vmatpush1.bf16.msra.mxu0 %v961_v1  ;;  %v2838_v24 = vmul.f32 %v832_v39, %v2758_v23 }
 0x141   :  { %v2026_v2 = vpop.eup %2025  ;;  %v2840_v36 = vmul.f32 0.5, %v573_v46  ;;  %v964_v17 = vpack.c.bf16 %v2785_v32, %v2755_v21  ;;  %v468_v57 = vadd.f32 %v2749_v18, %v196_v53  ;;  %v2850_v49 = vmul.f32 %v833_v45, %v2764_v30 }
 0x142   :  { %v2028_v0 = vpop.eup %2027  ;;  %2039 = vtanh.f32 %v715_v40  ;;  %v581_v55 = vadd.f32 %v2760_v25, %v196_v53  ;;  %v470_v1 = vadd.f32 %v2762_v27, %v196_v53  ;;  %v2859_v18 = vmul.f32 %v835_v12, %v2769_v42 }
 0x143   :  { %v2835_v20 = vpop.f32.mrb[20].mxu0  ;;  %v2030_v21 = vpop.eup %2029  ;;  %v2861_v32 = vmul.f32 0.5, %v464_v16  ;;  %2041 = vtanh.f32 %v714_v56  ;;  %1250 = vmatprep.subr.bf16.mxu1 %v964_v17  ;;  %v717_v13 = vmul.f32 0.851, %v468_v57  ;;  %v2867_v27 = vmul.f32 0.5, %v577_v29 }
 0x144   :  { %v2845_v7 = vpop.f32.mrb[20].mxu1  ;;  %v2847_v9 = vpop.f32.mrb[21].mxu0  ;;  %v837_v28 = vadd.f32 1.0, %v2030_v21  ;;  %2043 = vtanh.f32 %v716_v51  ;;  %v719_v39 = vmul.f32 0.851, %v581_v55  ;;  %1251 = vmatpush1.bf16.msra.mxu1 %v963_v4  ;;  %v834_v44 = vadd.f32 1.0, %v2026_v2 }
 0x145   :  { %v2854_v23 = vpop.f32.mrb[21].mxu1  ;;  %v2856_v46 = vpop.f32.mrb[22].mxu0  ;;  %2045 = vtanh.f32 %v717_v13  ;;  %v718_v5 = vmul.f32 0.851, %v470_v1  ;;  %v583_v40 = vadd.f32 %v2766_v37, %v196_v53  ;;  %v836_v51 = vadd.f32 1.0, %v2028_v0 }
 0x146   :  { %v2863_v30 = vpop.f32.mrb[22].mxu1  ;;  %v2865_v14 = vpop.f32.mrb[23].mxu0  ;;  %v2874_v12 = vmul.f32 %v837_v28, %v645_v47  ;;  %2047 = vtanh.f32 %v719_v39  ;;  %v2884_v2 = vmul.f32 0.5, %v2815_v34  ;;  %v2887_v47 = vmul.f32 0.5, %v2822_v22 }
 0x147   :  { %v2032_v25 = vpop.eup %2031  ;;  %v2872_v42 = vpop.f32.mrb[23].mxu1  ;;  %2049 = vtanh.f32 %v718_v5  ;;  %v720_v37 = vmul.f32 0.851, %v583_v40  ;;  %v655_v5 = vmul.f32 0.5, %v581_v55  ;;  %v966_v55 = vpack.c.bf16 %v2826_v11, %v2805_v48 }
 0x148   :  { %v201_v16 = vpop.permute.xlu0 %200  ;;  %v839_v45 = vadd.f32 1.0, %v2032_v25  ;;  %v2034_v56 = vpop.eup %2033 }
 0x149   :  { %v474_v29 = vadd.f32 %v2782_v58, %v201_v16  ;;  %v587_v59 = vadd.f32 %v2790_v60, %v201_v16  ;;  %v2036_v61 = vpop.eup %2035  ;;  %v2892_v58 = vmul.f32 %v834_v44, %v2796_v41  ;;  %v476_v0 = vadd.f32 %v2792_v62, %v201_v16  ;;  %1139 = vmatprep.subr.bf16.mxu0 %v966_v55 }
 0x14a   :  { %v2878_v17 = vmul.f32 %v839_v45, %v647_v50  ;;  %v2038_v34 = vpop.eup %2037  ;;  %v838_v25 = vadd.f32 1.0, %v2034_v56  ;;  %v840_v22 = vadd.f32 1.0, %v2036_v61  ;;  %2051 = vtanh.f32 %v720_v37 }
 0x14b   :  { %v2889_v53 = vpop.f32.mrb[24].mxu0  ;;  %v721_v60 = vmul.f32 0.851, %v474_v29  ;;  %v723_v28 = vmul.f32 0.851, %v587_v59  ;;  %v2906_v41 = vmul.f32 %v836_v51, %v2798_v3  ;;  %v653_v44 = vmul.f32 0.5, %v468_v57 }
 0x14c   :  { %v2897_v21 = vpop.f32.mrb[24].mxu1  ;;  %v2899_v13 = vpop.f32.mrb[25].mxu0  ;;  %v841_v4 = vadd.f32 1.0, %v2038_v34  ;;  %v2912_v56 = vmul.f32 0.5, %v470_v1  ;;  %v2915_v61 = vadd.f32 %v2800_v31, %v201_v16  ;;  %v2919_v3 = vmul.f32 0.5, %v583_v40 }
 0x14d   :  { %v2901_v39 = vpop.f32.mrb[25].mxu1  ;;  %v2903_v45 = vpop.f32.mrb[26].mxu0  ;;  %2053 = vtanh.f32 %v721_v60  ;;  %v722_v57 = vmul.f32 0.851, %v476_v0  ;;  %v968_v51 = vpack.c.bf16 %v2838_v24, %v2810_v15  ;;  %v2926_v1 = vmul.f32 %v838_v25, %v2828_v26 }
 0x14e   :  { %v2908_v62 = vpop.f32.mrb[26].mxu1  ;;  %v2910_v8 = vpop.f32.mrb[27].mxu0  ;;  %2055 = vtanh.f32 %v723_v28  ;;  %v2929_v31 = vmul.f32 %v840_v22, %v2840_v36  ;;  %v2931_v16 = vmul.f32 0.5, %v474_v29  ;;  %v2933_v28 = vmul.f32 0.5, %v587_v59 }
 0x14f   :  { %v2040_v50 = vpop.eup %2039  ;;  %v2917_v37 = vpop.f32.mrb[27].mxu1  ;;  %1252 = vmatprep.subr.bf16.mxu1 %v968_v51  ;;  %v2939_v26 = vmul.f32 %v841_v4, %v2861_v32  ;;  %v2941_v36 = vmul.f32 0.5, %v476_v0  ;;  %v3667_v29 = vpack.c.bf16 %v2777_v52, %v2772_v35  ;;  %v3668_v59 = vpack.c.bf16 %v2779_v54, %v2775_v43 }
 0x150   :  { %3666 = vst [vmem:[#allocation6_spill] sm:$0xff] %v2917_v37  ;;  %v2042_v63 = vpop.eup %2041  ;;  %v206_v34 = vpop.permute.xlu1 %205  ;;  %v843_v33 = vadd.f32 1.0, %v2040_v50  ;;  %v724_v37 = vmul.f32 0.851, %v2915_v61  ;;  %2057 = vtanh.f32 %v722_v57 }
 0x151   :  { %v2044_v60 = vpop.eup %2043  ;;  %v478_v48 = vadd.f32 %v2802_v6, %v206_v34  ;;  %v591_v15 = vadd.f32 %v2807_v19, %v206_v34  ;;  %1140 = vmatpush1.bf16.msra.mxu0 %v3667_v29  ;;  %1253 = vmatpush1.bf16.msra.mxu1 %v3668_v59  ;;  %v480_v50 = vadd.f32 %v2817_v10, %v206_v34  ;;  %v842_v35 = vadd.f32 1.0, %v2042_v63 }
 0x152   :  { %v2046_v40 = vpop.eup %2045  ;;  %v593_v4 = vadd.f32 %v2819_v38, %v206_v34  ;;  %2059 = vtanh.f32 %v724_v37  ;;  %v2964_v55 = vmul.f32 %v843_v33, %v2867_v27  ;;  %v211_v33 = vpop.permute.xlu0 %210 }
 0x153   :  { %v2048_v11 = vpop.eup %2047  ;;  %v845_v24 = vadd.f32 1.0, %v2046_v40  ;;  %v2950_v6 = vpop.f32.mrb[28].mxu0  ;;  %v725_v32 = vmul.f32 0.851, %v478_v48  ;;  %v727_v43 = vmul.f32 0.851, %v591_v15  ;;  %v486_v37 = vadd.f32 %v2847_v9, %v211_v33 }
 0x154   :  { %v2050_v19 = vpop.eup %2049  ;;  %v847_v25 = vadd.f32 1.0, %v2048_v11  ;;  %v2953_v0 = vpop.f32.mrb[28].mxu1  ;;  %v726_v38 = vmul.f32 0.851, %v480_v50  ;;  %v728_v29 = vmul.f32 0.851, %v593_v4  ;;  %v599_v27 = vadd.f32 %v2854_v23, %v211_v33 }
 0x155   :  { %v2955_v22 = vpop.f32.mrb[29].mxu0  ;;  %v2957_v52 = vmul.f32 %v845_v24, %v653_v44  ;;  %v2959_v54 = vpop.f32.mrb[29].mxu1  ;;  %2061 = vtanh.f32 %v725_v32  ;;  %v844_v44 = vadd.f32 1.0, %v2044_v60  ;;  %v846_v40 = vadd.f32 1.0, %v2050_v19 }
 0x156   :  { %v2961_v10 = vpop.f32.mrb[30].mxu0  ;;  %v2966_v57 = vmul.f32 %v847_v25, %v655_v5  ;;  %v2968_v51 = vpop.f32.mrb[30].mxu1  ;;  %2063 = vtanh.f32 %v727_v43  ;;  %v484_v32 = vadd.f32 %v2835_v20, %v211_v33  ;;  %v597_v60 = vadd.f32 %v2845_v7, %v211_v33 }
 0x157   :  { %v2970_v34 = vpop.f32.mrb[31].mxu0  ;;  %v2052_v63 = vpop.eup %2051  ;;  %2065 = vtanh.f32 %v726_v38  ;;  %v2982_v19 = vmul.f32 %v842_v35, %v2884_v2  ;;  %v2985_v43 = vmul.f32 0.5, %v2915_v61  ;;  %v2989_v38 = vmul.f32 %v844_v44, %v2887_v47 }
 0x158   :  { %v2974_v11 = vpop.f32.mrb[31].mxu1  ;;  %v2054_v24 = vpop.eup %2053  ;;  %v848_v5 = vadd.f32 1.0, %v2052_v63  ;;  %2067 = vtanh.f32 %v728_v29  ;;  %v661_v63 = vmul.f32 0.5, %v478_v48  ;;  %v2992_v20 = vmul.f32 %v846_v40, %v2912_v56 }
 0x159   :  { %3669 = vst [vmem:[#allocation7_spill] sm:$0xff] %v2974_v11  ;;  %v2056_v59 = vpop.eup %2055  ;;  %v849_v25 = vadd.f32 1.0, %v2054_v24  ;;  %v663_v24 = vmul.f32 0.5, %v591_v15  ;;  %v729_v11 = vmul.f32 0.851, %v484_v32  ;;  %v2994_v9 = vmul.f32 0.5, %v480_v50  ;;  %v216_v48 = vpop.permute.xlu1 %215 }
 0x15a   :  { %v851_v7 = vadd.f32 1.0, %v2056_v59  ;;  %v731_v2 = vmul.f32 0.851, %v597_v60  ;;  %v2997_v35 = vmul.f32 %v848_v5, %v2919_v3  ;;  %v3002_v23 = vmul.f32 0.5, %v593_v4  ;;  %v2058_v44 = vpop.eup %2057 }
 0x15b   :  { %v3000_v61 = vmul.f32 %v849_v25, %v2931_v16  ;;  %v730_v47 = vmul.f32 0.851, %v486_v37  ;;  %2069 = vtanh.f32 %v729_v11  ;;  %v732_v15 = vmul.f32 0.851, %v599_v27 }
 0x15c   :  { %v970_v56 = vpack.c.bf16 %v2926_v1, %v2892_v58  ;;  %v972_v50 = vpack.c.bf16 %v2929_v31, %v2906_v41  ;;  %v2060_v40 = vpop.eup %2059  ;;  %v3008_v33 = vmul.f32 0.5, %v484_v32  ;;  %2071 = vtanh.f32 %v731_v2  ;;  %v221_v31 = vpop.permute.xlu0 %220 }
 0x15d   :  { %v488_v3 = vadd.f32 %v2856_v46, %v216_v48  ;;  %v601_v16 = vadd.f32 %v2863_v30, %v216_v48  ;;  %v3013_v5 = vmul.f32 %v851_v7, %v2933_v28  ;;  %v3015_v11 = vmul.f32 0.5, %v597_v60 }
 0x15e   :  { %1141 = vmatprep.subr.bf16.mxu0 %v970_v56  ;;  %1254 = vmatprep.subr.bf16.mxu1 %v972_v50  ;;  %v490_v58 = vadd.f32 %v2865_v14, %v216_v48  ;;  %v603_v41 = vadd.f32 %v2872_v42, %v216_v48  ;;  %v850_v29 = vadd.f32 1.0, %v2058_v44  ;;  %2073 = vtanh.f32 %v730_v47 }
 0x15f   :  { %v2062_v4 = vpop.eup %2061  ;;  %v733_v46 = vmul.f32 0.851, %v488_v3  ;;  %v3670_v30 = vpack.c.bf16 %v2874_v12, %v2850_v49  ;;  %v3671_v28 = vpack.c.bf16 %v2878_v17, %v2859_v18  ;;  %2075 = vtanh.f32 %v732_v15 }
 0x160   :  { %v2064_v1 = vpop.eup %2063  ;;  %v853_v59 = vadd.f32 1.0, %v2062_v4  ;;  %v735_v14 = vmul.f32 0.851, %v601_v16  ;;  %v494_v42 = vadd.f32 %v2889_v53, %v221_v31  ;;  %v3028_v7 = vmul.f32 0.5, %v486_v37 }
 0x161   :  { %1142 = vmatpush1.bf16.msra.mxu0 %v3670_v30  ;;  %1255 = vmatpush1.bf16.msra.mxu1 %v3671_v28  ;;  %v2066_v25 = vpop.eup %2065  ;;  %v855_v32 = vadd.f32 1.0, %v2064_v1  ;;  %2077 = vtanh.f32 %v733_v46  ;;  %v734_v2 = vmul.f32 0.851, %v490_v58  ;;  %v852_v44 = vadd.f32 1.0, %v2060_v40 }
 0x162   :  { %v3026_v60 = vmul.f32 %v853_v59, %v661_v63  ;;  %v2068_v47 = vpop.eup %2067  ;;  %2079 = vtanh.f32 %v735_v14  ;;  %v736_v12 = vmul.f32 0.851, %v603_v41  ;;  %v3033_v18 = vmul.f32 %v850_v29, %v2941_v36  ;;  %v3674_v14 = vld [vmem:[#allocation6_spill] sm:$0xff] }
 0x163   :  { %v3030_v49 = vmul.f32 %v855_v32, %v663_v24  ;;  %v854_v48 = vadd.f32 1.0, %v2066_v25  ;;  %v3037_v53 = vmul.f32 0.5, %v599_v27  ;;  %v856_v63 = vadd.f32 1.0, %v2068_v47 }
 0x164   :  { %v977_v17 = vpack.c.bf16 %v3026_v60, %v3000_v61  ;;  %2081 = vtanh.f32 %v734_v2  ;;  %v737_v15 = vmul.f32 0.851, %v494_v42  ;;  %v607_v24 = vadd.f32 %v2897_v21, %v221_v31 }
 0x165   :  { %v979_v37 = vpack.c.bf16 %v3030_v49, %v3013_v5  ;;  %2083 = vtanh.f32 %v736_v12  ;;  %v496_v56 = vadd.f32 %v2899_v13, %v221_v31  ;;  %v609_v36 = vadd.f32 %v2901_v39, %v221_v31  ;;  %v2070_v50 = vpop.eup %2069 }
 0x166   :  { %v3045_v40 = vmul.f32 %v852_v44, %v2985_v43  ;;  %2085 = vtanh.f32 %v737_v15  ;;  %v974_v27 = vpack.c.bf16 %v2992_v20, %v2982_v19  ;;  %v976_v4 = vpack.c.bf16 %v2997_v35, %v2989_v38  ;;  %v2072_v1 = vpop.eup %2071  ;;  %v226_v20 = vpop.permute.xlu1 %225 }
 0x167   :  { %v669_v29 = vmul.f32 0.5, %v488_v3  ;;  %v671_v59 = vmul.f32 0.5, %v601_v16  ;;  %v3051_v46 = vmul.f32 0.5, %v490_v58  ;;  %v739_v21 = vmul.f32 0.851, %v607_v24 }
 0x168   :  { %v3054_v13 = vmul.f32 %v854_v48, %v2994_v9  ;;  %v3056_v39 = vmul.f32 0.5, %v603_v41  ;;  %v3058_v43 = vmul.f32 0.5, %v494_v42  ;;  %v738_v31 = vmul.f32 0.851, %v496_v56  ;;  %1143 = vmatprep.subr.bf16.mxu0 %v974_v27  ;;  %1256 = vmatprep.subr.bf16.mxu1 %v976_v4  ;;  %v2074_v19 = vpop.eup %2073 }
 0x169   :  { %v3061_v38 = vmul.f32 %v856_v63, %v3002_v23  ;;  %v857_v35 = vadd.f32 1.0, %v2070_v50  ;;  %2087 = vtanh.f32 %v739_v21  ;;  %v740_v3 = vmul.f32 0.851, %v609_v36  ;;  %v2076_v58 = vpop.eup %2075 }
 0x16a   :  { %v3672_v16 = vpack.c.bf16 %v2957_v52, %v2939_v26  ;;  %v3673_v9 = vpack.c.bf16 %v2966_v57, %v2964_v55  ;;  %v859_v41 = vadd.f32 1.0, %v2072_v1  ;;  %2089 = vtanh.f32 %v738_v31 }
 0x16b   :  { %v498_v30 = vadd.f32 %v2903_v45, %v226_v20  ;;  %v611_v28 = vadd.f32 %v2908_v62, %v226_v20  ;;  %v2078_v23 = vpop.eup %2077  ;;  %v3071_v25 = vmul.f32 0.5, %v607_v24  ;;  %2091 = vtanh.f32 %v740_v3  ;;  %v231_v24 = vpop.permute.xlu0 %230 }
 0x16c   :  { %1144 = vmatpush1.bf16.msra.mxu0 %v3672_v16  ;;  %1257 = vmatpush1.bf16.msra.mxu1 %v3673_v9  ;;  %v500_v32 = vadd.f32 %v2910_v8, %v226_v20  ;;  %v613_v26 = vadd.f32 %v3674_v14, %v226_v20  ;;  %v2080_v52 = vpop.eup %2079  ;;  %v858_v42 = vadd.f32 1.0, %v2074_v19  ;;  %v861_v2 = vadd.f32 1.0, %v2078_v23 }
 0x16d   :  { %v3075_v55 = vmul.f32 0.5, %v496_v56  ;;  %v741_v57 = vmul.f32 0.851, %v498_v30  ;;  %v860_v47 = vadd.f32 1.0, %v2076_v58  ;;  %v863_v44 = vadd.f32 1.0, %v2080_v52 }
 0x16e   :  { %v743_v12 = vmul.f32 0.851, %v611_v28  ;;  %v742_v45 = vmul.f32 0.851, %v500_v32  ;;  %v2082_v48 = vpop.eup %2081  ;;  %v3078_v62 = vmul.f32 %v857_v35, %v3008_v33  ;;  %v3080_v63 = vmul.f32 %v861_v2, %v669_v29 }
 0x16f   :  { %v3082_v15 = vmul.f32 0.5, %v609_v36  ;;  %2093 = vtanh.f32 %v741_v57  ;;  %v2084_v8 = vpop.eup %2083  ;;  %v3085_v50 = vmul.f32 %v859_v41, %v3015_v11  ;;  %v3087_v56 = vmul.f32 %v863_v44, %v671_v59 }
 0x170   :  { %2095 = vtanh.f32 %v743_v12  ;;  %v744_v27 = vmul.f32 0.851, %v613_v26  ;;  %v2086_v4 = vpop.eup %2085  ;;  %v3090_v1 = vmul.f32 %v858_v42, %v3028_v7  ;;  %v981_v33 = vpack.c.bf16 %v3080_v63, %v3078_v62 }
 0x171   :  { %2097 = vtanh.f32 %v742_v45  ;;  %v3095_v36 = vadd.f32 %v2950_v6, %v231_v24  ;;  %v3098_v29 = vmul.f32 %v860_v47, %v3037_v53  ;;  %v983_v11 = vpack.c.bf16 %v3087_v56, %v3085_v50 }
 0x172   :  { %v862_v59 = vadd.f32 1.0, %v2082_v48  ;;  %2099 = vtanh.f32 %v744_v27  ;;  %v864_v21 = vadd.f32 1.0, %v2084_v8  ;;  %v865_v31 = vadd.f32 1.0, %v2086_v4 }
 0x173   :  { %v3103_v7 = vadd.f32 %v2953_v0, %v231_v24  ;;  %v3106_v19 = vadd.f32 %v2955_v22, %v231_v24  ;;  %v2088_v20 = vpop.eup %2087  ;;  %v745_v6 = vmul.f32 0.851, %v3095_v36  ;;  %v3110_v35 = vadd.f32 %v2959_v54, %v231_v24  ;;  %v236_v54 = vpop.permute.xlu1 %235 }
 0x174   :  { %v978_v53 = vpack.c.bf16 %v3054_v13, %v3033_v18  ;;  %v980_v3 = vpack.c.bf16 %v3061_v38, %v3045_v40  ;;  %v2090_v16 = vpop.eup %2089  ;;  %v867_v9 = vadd.f32 1.0, %v2088_v20  ;;  %v677_v58 = vmul.f32 0.5, %v498_v30 }
 0x175   :  { %v679_v0 = vmul.f32 0.5, %v611_v28  ;;  %v747_v41 = vmul.f32 0.851, %v3103_v7  ;;  %v2092_v22 = vpop.eup %2091  ;;  %v866_v23 = vadd.f32 1.0, %v2090_v16  ;;  %v678_v14 = vmul.f32 0.5, %v500_v32 }
 0x176   :  { %v680_v52 = vmul.f32 0.5, %v613_v26  ;;  %v746_v42 = vmul.f32 0.851, %v3106_v19  ;;  %1145 = vmatprep.subr.bf16.mxu0 %v978_v53  ;;  %1258 = vmatprep.subr.bf16.mxu1 %v980_v3  ;;  %v926_v18 = vmul.f32 %v862_v59, %v3051_v46  ;;  %v928_v13 = vmul.f32 %v864_v21, %v3056_v39  ;;  %v3675_v26 = vld [vmem:[#allocation7_spill] sm:$0xff] }
 0x177   :  { %v929_v40 = vmul.f32 %v865_v31, %v3058_v43  ;;  %v748_v38 = vmul.f32 0.851, %v3110_v35  ;;  %1146 = vmatpush1.bf16.msra.mxu0 %v977_v17  ;;  %1259 = vmatpush1.bf16.msra.mxu1 %v979_v37  ;;  %v868_v30 = vadd.f32 1.0, %v2092_v22  ;;  %2101 = vtanh.f32 %v745_v6 }
 0x178   :  { %v508_v28 = vadd.f32 %v2961_v10, %v236_v54  ;;  %v621_v46 = vadd.f32 %v2968_v51, %v236_v54  ;;  %v931_v39 = vmul.f32 %v867_v9, %v3071_v25  ;;  %2103 = vtanh.f32 %v747_v41 }
 0x179   :  { %v2094_v32 = vpop.eup %2093  ;;  %v510_v43 = vadd.f32 %v2970_v34, %v236_v54  ;;  %v3133_v2 = vadd.f32 %v3675_v26, %v236_v54  ;;  %v930_v60 = vmul.f32 %v866_v23, %v3075_v55  ;;  %2105 = vtanh.f32 %v746_v42  ;;  %v1983_v26 = vld [vmem:[%s3659_s3 + $0x10] sm:$0xff]  }
 0x17a   :  { %v2096_v61 = vpop.eup %2095  ;;  %v869_v5 = vadd.f32 1.0, %v2094_v32  ;;  %v749_v49 = vmul.f32 0.851, %v508_v28  ;;  %2107 = vtanh.f32 %v748_v38  ;;  %v751_v10 = vmul.f32 0.851, %v621_v46 }
 0x17b   :  { %v2098_v17 = vpop.eup %2097  ;;  %v871_v37 = vadd.f32 1.0, %v2096_v61  ;;  %v750_v51 = vmul.f32 0.851, %v510_v43  ;;  %v932_v25 = vmul.f32 %v868_v30, %v3082_v15  ;;  %v752_v45 = vmul.f32 0.851, %v3133_v2  ;;  %v1985_v61 = vld [vmem:[%s3659_s3 + $0x20] sm:$0xff]  }
 0x17c   :  { %v2100_v57 = vpop.eup %2099  ;;  %v933_v47 = vmul.f32 %v869_v5, %v677_v58  ;;  %v870_v44 = vadd.f32 1.0, %v2098_v17  ;;  %2109 = vtanh.f32 %v749_v49  ;;  %v982_v8 = vpack.c.bf16 %v926_v18, %v3090_v1  ;;  %v1987_v5 = vld [vmem:[%s3659_s3 + $0x30] sm:$0xff]   ;;  %v1988_v49 = vld [vmem:[%s3659_s3 + $0x38] sm:$0xff]   ;;  %v1012_v17 = vpop.permute.xlu0 %1011 }
 0x17d   :  { %v935_v34 = vmul.f32 %v871_v37, %v679_v0  ;;  %v872_v12 = vadd.f32 1.0, %v2100_v57  ;;  %2111 = vtanh.f32 %v751_v10  ;;  %v984_v4 = vpack.c.bf16 %v928_v13, %v3098_v29  ;;  %v1017_v37 = vpop.permute.xlu1 %1016 }
 0x17e   :  { %v985_v55 = vpack.c.bf16 %v933_v47, %v929_v40  ;;  %v934_v48 = vmul.f32 %v870_v44, %v678_v14  ;;  %2113 = vtanh.f32 %v750_v51  ;;  %1147 = vmatprep.subr.bf16.mxu0 %v982_v8  ;;  %v681_v53 = vmul.f32 0.5, %v3095_v36 }
 0x17f   :  { %v987_v24 = vpack.c.bf16 %v935_v34, %v931_v39  ;;  %v936_v27 = vmul.f32 %v872_v12, %v680_v52  ;;  %2115 = vtanh.f32 %v752_v45  ;;  %1260 = vmatprep.subr.bf16.mxu1 %v984_v4  ;;  %1148 = vmatpush1.bf16.msra.mxu0 %v981_v33  ;;  %v683_v3 = vmul.f32 0.5, %v3103_v7 }
 0x180   :  { %v986_v15 = vpack.c.bf16 %v934_v48, %v930_v60  ;;  %1261 = vmatpush1.bf16.msra.mxu1 %v983_v11  ;;  %v682_v33 = vmul.f32 0.5, %v3106_v19  ;;  %v685_v50 = vmul.f32 0.5, %v508_v28  ;;  %v684_v9 = vmul.f32 0.5, %v3110_v35  ;;  %v1986_v60 = vld [vmem:[%s3659_s3 + $0x28] sm:$0xff]  }
 0x181   :  { %v988_v59 = vpack.c.bf16 %v936_v27, %v932_v25  ;;  %v2102_v21 = vpop.eup %2101  ;;  %v687_v0 = vmul.f32 0.5, %v621_v46  ;;  %v686_v36 = vmul.f32 0.5, %v510_v43  ;;  %v688_v54 = vmul.f32 0.5, %v3133_v2  ;;  %v1981_v46 = vld [vmem:[%s3659_s3] sm:$0xff]   ;;  %v1982_v43 = vld [vmem:[%s3659_s3 + $0x8] sm:$0xff]   ;;  %v1984_v2 = vld [vmem:[%s3659_s3 + $0x18] sm:$0xff]  }
 0x182   :  { %1149 = vmatprep.subr.bf16.mxu0 %v986_v15  ;;  %v2104_v1 = vpop.eup %2103  ;;  %v873_v6 = vadd.f32 1.0, %v2102_v21  ;;  %v3676_v39 = vmov 0  }
 0x183   :  { %1262 = vmatprep.subr.bf16.mxu1 %v988_v59  ;;  %v2106_v31 = vpop.eup %2105  ;;  %1150 = vmatpush1.bf16.msra.mxu0 %v985_v55  ;;  %v875_v62 = vadd.f32 1.0, %v2104_v1 }
 0x184   :  { %v2108_v20 = vpop.eup %2107  ;;  %1263 = vmatpush1.bf16.msra.mxu1 %v987_v24  ;;  %v874_v16 = vadd.f32 1.0, %v2106_v31  ;;  %v937_v23 = vmul.f32 %v873_v6, %v681_v53  ;;  %v1022_v53 = vpop.permute.xlu0 %1021 }
 0x185   :  { %v876_v58 = vadd.f32 1.0, %v2108_v20  ;;  %v939_v7 = vmul.f32 %v875_v62, %v683_v3 }
 0x186   :  { %v2110_v29 = vpop.eup %2109  ;;  %v938_v19 = vmul.f32 %v874_v16, %v682_v33 }
 0x187   :  { %v2112_v63 = vpop.eup %2111  ;;  %v877_v56 = vadd.f32 1.0, %v2110_v29  ;;  %v940_v38 = vmul.f32 %v876_v58, %v684_v9 }
 0x188   :  { %v2114_v11 = vpop.eup %2113  ;;  %v879_v41 = vadd.f32 1.0, %v2112_v63 }
 0x189   :  { %v2116_v22 = vpop.eup %2115  ;;  %v941_v14 = vmul.f32 %v877_v56, %v685_v50  ;;  %v878_v52 = vadd.f32 1.0, %v2114_v11 }
 0x18a   :  { %v943_v42 = vmul.f32 %v879_v41, %v687_v0  ;;  %v880_v18 = vadd.f32 1.0, %v2116_v22 }
 0x18b   :  { %v989_v13 = vpack.c.bf16 %v941_v14, %v937_v23  ;;  %v942_v40 = vmul.f32 %v878_v52, %v686_v36  ;;  %v1027_v52 = vpop.permute.xlu1 %1026 }
 0x18c   :  { %v991_v30 = vpack.c.bf16 %v943_v42, %v939_v7  ;;  %v944_v28 = vmul.f32 %v880_v18, %v688_v54 }
 0x18d   :  { %v990_v35 = vpack.c.bf16 %v942_v40, %v938_v19 }
 0x18e   :  { %v992_v32 = vpack.c.bf16 %v944_v28, %v940_v38 }
 0x18f   :  { %1151 = vmatprep.subr.bf16.mxu0 %v990_v35 }
 0x190   :  { %1264 = vmatprep.subr.bf16.mxu1 %v992_v32  ;;  %1152 = vmatpush1.bf16.msra.mxu0 %v989_v13 }
 0x191   :  { %1265 = vmatpush1.bf16.msra.mxu1 %v991_v30 }
 0x193   :  { %1170 = vmatmul.mubr.bf16.vlgmr.msra.gmra.mrb[32].mxu0 %v1981_v46 }
 0x194   :  { %1283 = vmatmul.mubr.bf16.vlgmr.msra.gmra.mrb[32].mxu1 %v1981_v46  ;;  %1179 = vmatprep.mubr.bf16.mxu0 %v3676_v39 }
 0x195   :  { %1292 = vmatprep.mubr.bf16.mxu1 %v3676_v39 }
 0x19b   :  { %1180 = vmatmul.mubr.bf16.gmra.mrb[36].mxu0 %v1982_v43 }
 0x19c   :  { %1293 = vmatmul.mubr.bf16.gmra.mrb[36].mxu1 %v1982_v43  ;;  %1189 = vmatprep.mubr.bf16.mxu0 %v3676_v39 }
 0x19d   :  { %1302 = vmatprep.mubr.bf16.mxu1 %v3676_v39 }
 0x1a3   :  { %1190 = vmatmul.mubr.bf16.gmra.mrb[40].mxu0 %v1983_v26 }
 0x1a4   :  { %1303 = vmatmul.mubr.bf16.gmra.mrb[40].mxu1 %v1983_v26  ;;  %1199 = vmatprep.mubr.bf16.mxu0 %v3676_v39 }
 0x1a5   :  { %1312 = vmatprep.mubr.bf16.mxu1 %v3676_v39 }
 0x1ab   :  { %1200 = vmatmul.mubr.bf16.gmra.mrb[44].mxu0 %v1984_v2 }
 0x1ac   :  { %1313 = vmatmul.mubr.bf16.gmra.mrb[44].mxu1 %v1984_v2  ;;  %1209 = vmatprep.mubr.bf16.mxu0 %v3676_v39 }
 0x1ad   :  { %1322 = vmatprep.mubr.bf16.mxu1 %v3676_v39 }
 0x1b3   :  { %1210 = vmatmul.mubr.bf16.gmra.mrb[48].mxu0 %v1985_v61 }
 0x1b4   :  { %1323 = vmatmul.mubr.bf16.gmra.mrb[48].mxu1 %v1985_v61  ;;  %1219 = vmatprep.mubr.bf16.mxu0 %v3676_v39 }
 0x1b5   :  { %1332 = vmatprep.mubr.bf16.mxu1 %v3676_v39 }
 0x1bb   :  { %1220 = vmatmul.mubr.bf16.gmra.mrb[52].mxu0 %v1986_v60 }
 0x1bc   :  { %1333 = vmatmul.mubr.bf16.gmra.mrb[52].mxu1 %v1986_v60  ;;  %1229 = vmatprep.mubr.bf16.mxu0 %v3676_v39 }
 0x1bd   :  { %1342 = vmatprep.mubr.bf16.mxu1 %v3676_v39 }
 0x1c3   :  { %1230 = vmatmul.mubr.bf16.gmra.mrb[56].mxu0 %v1987_v5 }
 0x1c4   :  { %1343 = vmatmul.mubr.bf16.gmra.mrb[56].mxu1 %v1987_v5  ;;  %1239 = vmatprep.mubr.bf16.mxu0 %v3676_v39 }
 0x1c5   :  { %1352 = vmatprep.mubr.bf16.mxu1 %v3676_v39 }
 0x1cb   :  { %1240 = vmatmul.mubr.bf16.gmra.mrb[60].mxu0 %v1988_v49 }
 0x1cc   :  { %1353 = vmatmul.mubr.bf16.gmra.mrb[60].mxu1 %v1988_v49  ;;  %1758 = vmatprep.mubr.bf16.mxu0 %v3676_v39 }
 0x1cd   :  { %1799 = vmatprep.mubr.bf16.mxu1 %v3676_v39 }
 0x266   :  { %v1171_v10 = vpop.f32.mrb[32].mxu0 }
 0x267   :  { %v1172_v51 = vadd.f32 %v1171_v10, %v1012_v17  ;;  %v1284_v57 = vpop.f32.mrb[32].mxu1  ;;  %v1173_v25 = vpop.f32.mrb[33].mxu0 }
 0x268   :  { %v1285_v47 = vadd.f32 %v1284_v57, %v1012_v17  ;;  %v1174_v44 = vadd.f32 %v1173_v25, %v1012_v17  ;;  %v1286_v34 = vpop.f32.mrb[33].mxu1  ;;  %v1175_v12 = vpop.f32.mrb[34].mxu0 }
 0x269   :  { %v1427_v45 = vmul.f32 0.851, %v1172_v51  ;;  %v1287_v55 = vadd.f32 %v1286_v34, %v1012_v17  ;;  %v1176_v48 = vadd.f32 %v1175_v12, %v1017_v37  ;;  %v1288_v8 = vpop.f32.mrb[34].mxu1  ;;  %v1177_v24 = vpop.f32.mrb[35].mxu0  ;;  %v1363_v41 = vmul.f32 0.5, %v1172_v51 }
 0x26a   :  { %v1429_v27 = vmul.f32 0.851, %v1285_v47  ;;  %v1428_v4 = vmul.f32 0.851, %v1174_v44  ;;  %v1290_v59 = vpop.f32.mrb[35].mxu1  ;;  %v1289_v1 = vadd.f32 %v1288_v8, %v1017_v37  ;;  %v1178_v31 = vadd.f32 %v1177_v24, %v1017_v37  ;;  %v1032_v8 = vpop.permute.xlu0 %1031 }
 0x26b   :  { %2117 = vtanh.f32 %v1427_v45  ;;  %v1430_v15 = vmul.f32 0.851, %v1287_v55  ;;  %v1431_v21 = vmul.f32 0.851, %v1176_v48  ;;  %v1291_v20 = vadd.f32 %v1290_v59, %v1017_v37 }
 0x26c   :  { %2119 = vtanh.f32 %v1429_v27  ;;  %v1433_v6 = vmul.f32 0.851, %v1289_v1  ;;  %v1432_v3 = vmul.f32 0.851, %v1178_v31  ;;  %v3191_v22 = vmul.f32 0.5, %v1285_v47 }
 0x26d   :  { %2121 = vtanh.f32 %v1428_v4  ;;  %v1434_v62 = vmul.f32 0.851, %v1291_v20  ;;  %v3193_v7 = vmul.f32 0.5, %v1174_v44  ;;  %v3195_v38 = vmul.f32 0.5, %v1287_v55 }
 0x26e   :  { %2123 = vtanh.f32 %v1430_v15  ;;  %v1181_v29 = vpop.f32.mrb[36].mxu0  ;;  %v1367_v30 = vmul.f32 0.5, %v1176_v48  ;;  %v1369_v32 = vmul.f32 0.5, %v1289_v1  ;;  %v3199_v61 = vmul.f32 0.5, %v1178_v31 }
 0x26f   :  { %2125 = vtanh.f32 %v1431_v21  ;;  %v1294_v63 = vpop.f32.mrb[36].mxu1  ;;  %v1182_v33 = vadd.f32 %v1181_v29, %v1022_v53  ;;  %v1183_v50 = vpop.f32.mrb[37].mxu0  ;;  %v3201_v37 = vmul.f32 0.5, %v1291_v20 }
 0x270   :  { %2127 = vtanh.f32 %v1433_v6  ;;  %v1295_v16 = vadd.f32 %v1294_v63, %v1022_v53  ;;  %v1296_v56 = vpop.f32.mrb[37].mxu1  ;;  %v1184_v11 = vadd.f32 %v1183_v50, %v1022_v53  ;;  %v1185_v58 = vpop.f32.mrb[38].mxu0 }
 0x271   :  { %v1297_v9 = vadd.f32 %v1296_v56, %v1022_v53  ;;  %v1298_v0 = vpop.f32.mrb[38].mxu1  ;;  %2129 = vtanh.f32 %v1432_v3  ;;  %v1435_v23 = vmul.f32 0.851, %v1182_v33  ;;  %v1187_v14 = vpop.f32.mrb[39].mxu0  ;;  %v1186_v19 = vadd.f32 %v1185_v58, %v1027_v52 }
 0x272   :  { %v1300_v36 = vpop.f32.mrb[39].mxu1  ;;  %2131 = vtanh.f32 %v1434_v62  ;;  %v1437_v42 = vmul.f32 0.851, %v1295_v16  ;;  %v1436_v54 = vmul.f32 0.851, %v1184_v11  ;;  %v1299_v13 = vadd.f32 %v1298_v0, %v1027_v52 }
 0x273   :  { %2133 = vtanh.f32 %v1435_v23  ;;  %v1438_v18 = vmul.f32 0.851, %v1297_v9  ;;  %v1188_v28 = vadd.f32 %v1187_v14, %v1027_v52  ;;  %v1439_v46 = vmul.f32 0.851, %v1186_v19 }
 0x274   :  { %2135 = vtanh.f32 %v1437_v42  ;;  %v3197_v39 = vadd.f32 %v1300_v36, %v1027_v52  ;;  %v1441_v60 = vmul.f32 0.851, %v1299_v13  ;;  %v3203_v10 = vmul.f32 0.5, %v1182_v33 }
 0x275   :  { %v2118_v40 = vpop.eup %2117  ;;  %2137 = vtanh.f32 %v1436_v54  ;;  %v3205_v51 = vmul.f32 0.5, %v1295_v16  ;;  %v3207_v34 = vmul.f32 0.5, %v1184_v11  ;;  %v1440_v12 = vmul.f32 0.851, %v1188_v28  ;;  %v1037_v11 = vpop.permute.xlu1 %1036 }
 0x276   :  { %v2120_v35 = vpop.eup %2119  ;;  %v1191_v43 = vpop.f32.mrb[40].mxu0  ;;  %v1555_v2 = vadd.f32 1.0, %v2118_v40  ;;  %2139 = vtanh.f32 %v1438_v18  ;;  %v3211_v27 = vmul.f32 0.5, %v1297_v9  ;;  %v1375_v4 = vmul.f32 0.5, %v1186_v19 }
 0x277   :  { %v2122_v26 = vpop.eup %2121  ;;  %v1304_v5 = vpop.f32.mrb[40].mxu1  ;;  %2141 = vtanh.f32 %v1439_v46  ;;  %v1557_v44 = vadd.f32 1.0, %v2120_v35  ;;  %v1442_v15 = vmul.f32 0.851, %v3197_v39  ;;  %v1377_v31 = vmul.f32 0.5, %v1299_v13 }
 0x278   :  { %v1193_v49 = vpop.f32.mrb[41].mxu0  ;;  %v2124_v17 = vpop.eup %2123  ;;  %2143 = vtanh.f32 %v1441_v60  ;;  %v3216_v21 = vmul.f32 %v1555_v2, %v1363_v41  ;;  %v1192_v20 = vadd.f32 %v1191_v43, %v1032_v8  ;;  %v1556_v29 = vadd.f32 1.0, %v2122_v26 }
 0x279   :  { %v1306_v57 = vpop.f32.mrb[41].mxu1  ;;  %v1195_v25 = vpop.f32.mrb[42].mxu0  ;;  %2145 = vtanh.f32 %v1440_v12  ;;  %v1305_v3 = vadd.f32 %v1304_v5, %v1032_v8  ;;  %v3221_v63 = vmul.f32 %v1557_v44, %v3191_v22  ;;  %v1558_v33 = vadd.f32 1.0, %v2124_v17 }
 0x27a   :  { %v2126_v47 = vpop.eup %2125  ;;  %v1308_v45 = vpop.f32.mrb[42].mxu1  ;;  %v1443_v50 = vmul.f32 0.851, %v1192_v20  ;;  %v3227_v58 = vmul.f32 0.5, %v1188_v28  ;;  %2147 = vtanh.f32 %v1442_v15  ;;  %v1194_v19 = vadd.f32 %v1193_v49, %v1032_v8 }
 0x27b   :  { %v3209_v55 = vpop.f32.mrb[43].mxu0  ;;  %v2128_v48 = vpop.eup %2127  ;;  %v1559_v24 = vadd.f32 1.0, %v2126_v47  ;;  %v1445_v0 = vmul.f32 0.851, %v1305_v3  ;;  %v1307_v13 = vadd.f32 %v1306_v57, %v1032_v8  ;;  %v3242_v35 = vmul.f32 %v1556_v29, %v3193_v7 }
 0x27c   :  { %v3214_v59 = vpop.f32.mrb[43].mxu1  ;;  %v1561_v1 = vadd.f32 1.0, %v2128_v48  ;;  %v2130_v6 = vpop.eup %2129  ;;  %2149 = vtanh.f32 %v1443_v50  ;;  %v3248_v46 = vmul.f32 0.5, %v3197_v39  ;;  %v1196_v43 = vadd.f32 %v1195_v25, %v1037_v11 }
 0x27d   :  { %v3218_v53 = vmul.f32 %v1559_v24, %v1367_v30  ;;  %v2132_v62 = vpop.eup %2131  ;;  %v1560_v14 = vadd.f32 1.0, %v2130_v6  ;;  %2151 = vtanh.f32 %v1445_v0  ;;  %v3254_v49 = vmul.f32 0.5, %v1192_v20 }
 0x27e   :  { %v3223_v16 = vmul.f32 %v1561_v1, %v1369_v32  ;;  %v2134_v56 = vpop.eup %2133  ;;  %v3229_v41 = vpop.f32.mrb[44].mxu0  ;;  %v3245_v32 = vmul.f32 %v1558_v33, %v3195_v38  ;;  %v1562_v5 = vadd.f32 1.0, %v2132_v62  ;;  %v1444_v17 = vmul.f32 0.851, %v1194_v19 }
 0x27f   :  { %v1684_v9 = vpack.c.bf16 %v3218_v53, %v3216_v21  ;;  %v2136_v23 = vpop.eup %2135  ;;  %v1563_v36 = vadd.f32 1.0, %v2134_v56  ;;  %v3233_v52 = vpop.f32.mrb[44].mxu1  ;;  %v1309_v57 = vadd.f32 %v1308_v45, %v1037_v11  ;;  %v1624_v38 = vmul.f32 %v1560_v14, %v3199_v61 }
 0x280   :  { %v1686_v22 = vpack.c.bf16 %v3223_v16, %v3221_v63  ;;  %v3235_v42 = vpop.f32.mrb[45].mxu0  ;;  %v2138_v54 = vpop.eup %2137  ;;  %v1565_v18 = vadd.f32 1.0, %v2136_v23  ;;  %v3259_v12 = vmul.f32 0.5, %v1305_v3  ;;  %v1446_v39 = vmul.f32 0.851, %v1307_v13 }
 0x281   :  { %v3237_v40 = vpop.f32.mrb[45].mxu1  ;;  %v3239_v30 = vpop.f32.mrb[46].mxu0  ;;  %v3262_v25 = vmul.f32 %v1563_v36, %v3203_v10  ;;  %v1564_v8 = vadd.f32 1.0, %v2138_v54  ;;  %2153 = vtanh.f32 %v1444_v17  ;;  %v1447_v45 = vmul.f32 0.851, %v1196_v43 }
 0x282   :  { %v2140_v28 = vpop.eup %2139  ;;  %v3250_v26 = vpop.f32.mrb[46].mxu1  ;;  %v3265_v48 = vmul.f32 %v1565_v18, %v3205_v51  ;;  %2155 = vtanh.f32 %v1446_v39  ;;  %v1449_v61 = vmul.f32 0.851, %v1309_v57  ;;  %v1198_v29 = vadd.f32 %v3209_v55, %v1037_v11 }
 0x283   :  { %v3252_v2 = vpop.f32.mrb[47].mxu0  ;;  %v2142_v60 = vpop.eup %2141  ;;  %v1566_v15 = vadd.f32 1.0, %v2140_v28  ;;  %v3275_v10 = vmul.f32 %v1562_v5, %v3201_v37  ;;  %2157 = vtanh.f32 %v1447_v45  ;;  %v3286_v55 = vmul.f32 0.5, %v1194_v19 }
 0x284   :  { %v3256_v47 = vpop.f32.mrb[47].mxu1  ;;  %v2144_v7 = vpop.eup %2143  ;;  %v1567_v44 = vadd.f32 1.0, %v2142_v60  ;;  %v3288_v56 = vmul.f32 0.5, %v1307_v13  ;;  %2159 = vtanh.f32 %v1449_v61  ;;  %v1448_v36 = vmul.f32 0.851, %v1198_v29 }
 0x285   :  { %v1569_v24 = vadd.f32 1.0, %v2144_v7  ;;  %v2146_v20 = vpop.eup %2145  ;;  %v1042_v14 = vpop.permute.xlu0 %1041  ;;  %v3300_v19 = vmul.f32 %v1566_v15, %v3211_v27  ;;  %v1685_v39 = vpack.c.bf16 %v1624_v38, %v3242_v35  ;;  %v1687_v38 = vpack.c.bf16 %v3275_v10, %v3245_v32 }
 0x286   :  { %v3267_v1 = vmul.f32 %v1567_v44, %v1375_v4  ;;  %v3272_v3 = vpop.f32.mrb[48].mxu0  ;;  %v1311_v4 = vadd.f32 %v3214_v59, %v1037_v11  ;;  %v3295_v59 = vmul.f32 %v1564_v8, %v3207_v34  ;;  %v1568_v11 = vadd.f32 1.0, %v2146_v20  ;;  %v1047_v45 = vpop.permute.xlu1 %1046 }
 0x287   :  { %v3269_v6 = vmul.f32 %v1569_v24, %v1377_v31  ;;  %v3280_v62 = vpop.f32.mrb[48].mxu1  ;;  %v3282_v33 = vpop.f32.mrb[49].mxu0  ;;  %v1202_v13 = vadd.f32 %v3229_v41, %v1042_v14  ;;  %v1315_v60 = vadd.f32 %v3233_v52, %v1042_v14  ;;  %v3305_v5 = vadd.f32 %v3235_v42, %v1042_v14  ;;  %1726 = vmatprep.subr.bf16.mxu0 %v1685_v39 }
 0x288   :  { %v2148_v31 = vpop.eup %2147  ;;  %v3290_v37 = vpop.f32.mrb[49].mxu1  ;;  %v1450_v54 = vmul.f32 0.851, %v1311_v4  ;;  %2161 = vtanh.f32 %v1448_v36  ;;  %v3312_v44 = vadd.f32 %v3237_v40, %v1042_v14  ;;  %v1383_v8 = vmul.f32 0.5, %v1196_v43  ;;  %1727 = vmatpush1.bf16.msra.mxu0 %v1684_v9  ;;  %1767 = vmatprep.subr.bf16.mxu1 %v1687_v38 }
 0x289   :  { %v3292_v0 = vpop.f32.mrb[50].mxu0  ;;  %v2150_v23 = vpop.eup %2149  ;;  %v1570_v7 = vadd.f32 1.0, %v2148_v31  ;;  %v1451_v41 = vmul.f32 0.851, %v1202_v13  ;;  %v3316_v52 = vmul.f32 %v1568_v11, %v3227_v58  ;;  %v1385_v24 = vmul.f32 0.5, %v1309_v57  ;;  %1768 = vmatpush1.bf16.msra.mxu1 %v1686_v22 }
 0x28a   :  { %v3297_v18 = vpop.f32.mrb[50].mxu1  ;;  %v2152_v28 = vpop.eup %2151  ;;  %v1571_v27 = vadd.f32 1.0, %v2150_v23  ;;  %2163 = vtanh.f32 %v1450_v54  ;;  %v1453_v15 = vmul.f32 0.851, %v1315_v60  ;;  %v3318_v20 = vmul.f32 0.5, %v1198_v29 }
 0x28b   :  { %v3307_v17 = vpop.f32.mrb[51].mxu0  ;;  %v3309_v34 = vpop.f32.mrb[51].mxu1  ;;  %v1573_v42 = vadd.f32 1.0, %v2152_v28  ;;  %2165 = vtanh.f32 %v1451_v41  ;;  %v1452_v40 = vmul.f32 0.851, %v3305_v5  ;;  %v3328_v43 = vmul.f32 %v1570_v7, %v3248_v46 }
 0x28c   :  { %v1454_v61 = vmul.f32 0.851, %v3312_v44  ;;  %v2154_v58 = vpop.eup %2153  ;;  %v3330_v57 = vmul.f32 0.5, %v1311_v4  ;;  %v1206_v29 = vadd.f32 %v3239_v30, %v1047_v45  ;;  %v3340_v21 = vmul.f32 %v1571_v27, %v3254_v49 }
 0x28d   :  { %v2156_v14 = vpop.eup %2155  ;;  %2167 = vtanh.f32 %v1453_v15  ;;  %v1319_v53 = vadd.f32 %v3250_v26, %v1047_v45  ;;  %v1208_v9 = vadd.f32 %v3252_v2, %v1047_v45  ;;  %v3349_v30 = vmul.f32 %v1573_v42, %v3259_v12 }
 0x28e   :  { %v3325_v35 = vpop.f32.mrb[52].mxu0  ;;  %v2158_v32 = vpop.eup %2157  ;;  %v3351_v10 = vmul.f32 0.5, %v1202_v13  ;;  %2169 = vtanh.f32 %v1452_v40  ;;  %v1455_v11 = vmul.f32 0.851, %v1206_v29  ;;  %v3357_v2 = vmul.f32 0.5, %v1315_v60 }
 0x28f   :  { %v3335_v31 = vpop.f32.mrb[52].mxu1  ;;  %v3337_v23 = vpop.f32.mrb[53].mxu0  ;;  %v1575_v54 = vadd.f32 1.0, %v2158_v32  ;;  %2171 = vtanh.f32 %v1454_v61  ;;  %v1457_v28 = vmul.f32 0.851, %v1319_v53  ;;  %v1572_v7 = vadd.f32 1.0, %v2154_v58 }
 0x290   :  { %v3344_v46 = vpop.f32.mrb[53].mxu1  ;;  %v3346_v4 = vpop.f32.mrb[54].mxu0  ;;  %2173 = vtanh.f32 %v1455_v11  ;;  %v1456_v27 = vmul.f32 0.851, %v1208_v9  ;;  %v1321_v42 = vadd.f32 %v3256_v47, %v1047_v45  ;;  %v1574_v40 = vadd.f32 1.0, %v2156_v14 }
 0x291   :  { %v3353_v49 = vpop.f32.mrb[54].mxu1  ;;  %v3355_v36 = vpop.f32.mrb[55].mxu0  ;;  %v3364_v41 = vmul.f32 %v1575_v54, %v1383_v8  ;;  %2175 = vtanh.f32 %v1457_v28  ;;  %v3374_v58 = vmul.f32 0.5, %v3305_v5  ;;  %v3377_v8 = vmul.f32 0.5, %v3312_v44 }
 0x292   :  { %v2160_v26 = vpop.eup %2159  ;;  %v3362_v12 = vpop.f32.mrb[55].mxu1  ;;  %2177 = vtanh.f32 %v1456_v27  ;;  %v1458_v47 = vmul.f32 0.851, %v1321_v42 }
 0x293   :  { %v1052_v13 = vpop.permute.xlu0 %1051  ;;  %v1577_v39 = vadd.f32 1.0, %v2160_v26  ;;  %v2162_v15 = vpop.eup %2161 }
 0x294   :  { %v1212_v60 = vadd.f32 %v3272_v3, %v1052_v13  ;;  %v1325_v63 = vadd.f32 %v3280_v62, %v1052_v13  ;;  %v2164_v16 = vpop.eup %2163  ;;  %v3382_v3 = vmul.f32 %v1572_v7, %v3286_v55  ;;  %v1214_v38 = vadd.f32 %v3282_v33, %v1052_v13 }
 0x295   :  { %v3368_v61 = vmul.f32 %v1577_v39, %v1385_v24  ;;  %v2166_v5 = vpop.eup %2165  ;;  %v1576_v11 = vadd.f32 1.0, %v2162_v15  ;;  %v1578_v44 = vadd.f32 1.0, %v2164_v16  ;;  %2179 = vtanh.f32 %v1458_v47 }
 0x296   :  { %v3379_v45 = vpop.f32.mrb[56].mxu0  ;;  %v1459_v62 = vmul.f32 0.851, %v1212_v60  ;;  %v1461_v26 = vmul.f32 0.851, %v1325_v63  ;;  %v3396_v55 = vmul.f32 %v1574_v40, %v3288_v56  ;;  %v1391_v7 = vmul.f32 0.5, %v1206_v29 }
 0x297   :  { %v3387_v14 = vpop.f32.mrb[56].mxu1  ;;  %v3389_v32 = vpop.f32.mrb[57].mxu0  ;;  %v1393_v39 = vmul.f32 0.5, %v1319_v53  ;;  %v1579_v22 = vadd.f32 1.0, %v2166_v5  ;;  %v3402_v15 = vmul.f32 0.5, %v1208_v9  ;;  %v3405_v16 = vadd.f32 %v3290_v37, %v1052_v13 }
 0x298   :  { %v3391_v54 = vpop.f32.mrb[57].mxu1  ;;  %v3393_v28 = vpop.f32.mrb[58].mxu0  ;;  %2181 = vtanh.f32 %v1459_v62  ;;  %v3409_v56 = vmul.f32 0.5, %v1321_v42  ;;  %v1460_v29 = vmul.f32 0.851, %v1214_v38  ;;  %v1689_v53 = vpack.c.bf16 %v3316_v52, %v3295_v59 }
 0x299   :  { %v3398_v33 = vpop.f32.mrb[58].mxu1  ;;  %v3400_v27 = vpop.f32.mrb[59].mxu0  ;;  %2183 = vtanh.f32 %v1461_v26  ;;  %v1691_v40 = vpack.c.bf16 %v3328_v43, %v3300_v19  ;;  %v3416_v9 = vmul.f32 %v1576_v11, %v3318_v20  ;;  %v3419_v37 = vmul.f32 %v1578_v44, %v3330_v57 }
 0x29a   :  { %v2168_v24 = vpop.eup %2167  ;;  %v3407_v47 = vpop.f32.mrb[59].mxu1  ;;  %v3421_v13 = vmul.f32 0.5, %v1212_v60  ;;  %v3423_v26 = vmul.f32 0.5, %v1325_v63  ;;  %1728 = vmatprep.subr.bf16.mxu0 %v1689_v53  ;;  %v3429_v20 = vmul.f32 %v1579_v22, %v3351_v10  ;;  %v3431_v57 = vmul.f32 0.5, %v1214_v38 }
 0x29b   :  { %3677 = vst [vmem:[#allocation6_spill] sm:$0xff] %v3407_v47  ;;  %v2170_v50 = vpop.eup %2169  ;;  %v1057_v5 = vpop.permute.xlu1 %1056  ;;  %v1581_v51 = vadd.f32 1.0, %v2168_v24  ;;  %v1462_v47 = vmul.f32 0.851, %v3405_v16  ;;  %1769 = vmatprep.subr.bf16.mxu1 %v1691_v40  ;;  %v3678_v60 = vpack.c.bf16 %v3267_v1, %v3262_v25  ;;  %v3679_v63 = vpack.c.bf16 %v3269_v6, %v3265_v48 }
 0x29c   :  { %v2172_v62 = vpop.eup %2171  ;;  %v1216_v59 = vadd.f32 %v3292_v0, %v1057_v5  ;;  %v1329_v19 = vadd.f32 %v3297_v18, %v1057_v5  ;;  %v1218_v24 = vadd.f32 %v3307_v17, %v1057_v5  ;;  %2185 = vtanh.f32 %v1460_v29 }
 0x29d   :  { %v2174_v42 = vpop.eup %2173  ;;  %1729 = vmatpush1.bf16.msra.mxu0 %v3678_v60  ;;  %1770 = vmatpush1.bf16.msra.mxu1 %v3679_v63  ;;  %v1331_v22 = vadd.f32 %v3309_v34, %v1057_v5  ;;  %v1580_v25 = vadd.f32 1.0, %v2170_v50  ;;  %2187 = vtanh.f32 %v1462_v47  ;;  %v3454_v53 = vmul.f32 %v1581_v51, %v3357_v2  ;;  %v1062_v51 = vpop.permute.xlu0 %1061 }
 0x29e   :  { %v2176_v52 = vpop.eup %2175  ;;  %v1583_v43 = vadd.f32 1.0, %v2174_v42  ;;  %v3440_v0 = vpop.f32.mrb[60].mxu0  ;;  %v1463_v10 = vmul.f32 0.851, %v1216_v59  ;;  %v1465_v48 = vmul.f32 0.851, %v1329_v19  ;;  %v1224_v47 = vadd.f32 %v3337_v23, %v1062_v51 }
 0x29f   :  { %v2178_v18 = vpop.eup %2177  ;;  %v1585_v11 = vadd.f32 1.0, %v2176_v52  ;;  %v3443_v38 = vpop.f32.mrb[60].mxu1  ;;  %v1464_v34 = vmul.f32 0.851, %v1218_v24  ;;  %v1466_v60 = vmul.f32 0.851, %v1331_v22  ;;  %v1337_v2 = vadd.f32 %v3344_v46, %v1062_v51 }
 0x2a0   :  { %v3445_v44 = vpop.f32.mrb[61].mxu0  ;;  %v3447_v1 = vmul.f32 %v1583_v43, %v1391_v7  ;;  %v3449_v6 = vpop.f32.mrb[61].mxu1  ;;  %2189 = vtanh.f32 %v1463_v10  ;;  %v1582_v7 = vadd.f32 1.0, %v2172_v62  ;;  %v1584_v42 = vadd.f32 1.0, %v2178_v18 }
 0x2a1   :  { %v3451_v17 = vpop.f32.mrb[62].mxu0  ;;  %v3456_v29 = vmul.f32 %v1585_v11, %v1393_v39  ;;  %v3458_v40 = vpop.f32.mrb[62].mxu1  ;;  %2191 = vtanh.f32 %v1465_v48  ;;  %v1222_v10 = vadd.f32 %v3325_v35, %v1062_v51  ;;  %v1335_v62 = vadd.f32 %v3335_v31, %v1062_v51 }
 0x2a2   :  { %v3460_v5 = vpop.f32.mrb[63].mxu0  ;;  %v2180_v50 = vpop.eup %2179  ;;  %2193 = vtanh.f32 %v1464_v34  ;;  %v3472_v18 = vmul.f32 %v1580_v25, %v3374_v58  ;;  %v3475_v48 = vmul.f32 0.5, %v3405_v16  ;;  %v3479_v34 = vmul.f32 %v1582_v7, %v3377_v8 }
 0x2a3   :  { %v3464_v52 = vpop.f32.mrb[63].mxu1  ;;  %v2182_v43 = vpop.eup %2181  ;;  %v1586_v39 = vadd.f32 1.0, %v2180_v50  ;;  %2195 = vtanh.f32 %v1466_v60  ;;  %v1399_v50 = vmul.f32 0.5, %v1216_v59  ;;  %v3482_v35 = vmul.f32 %v1584_v42, %v3402_v15 }
 0x2a4   :  { %3680 = vst [vmem:[#allocation7_spill] sm:$0xff] %v3464_v52  ;;  %v2184_v63 = vpop.eup %2183  ;;  %v1587_v11 = vadd.f32 1.0, %v2182_v43  ;;  %v1401_v43 = vmul.f32 0.5, %v1329_v19  ;;  %v1467_v52 = vmul.f32 0.851, %v1222_v10  ;;  %v3484_v23 = vmul.f32 0.5, %v1218_v24  ;;  %v1067_v59 = vpop.permute.xlu1 %1066 }
 0x2a5   :  { %v1589_v31 = vadd.f32 1.0, %v2184_v63  ;;  %v1469_v58 = vmul.f32 0.851, %v1335_v62  ;;  %v3487_v25 = vmul.f32 %v1586_v39, %v3409_v56  ;;  %v3492_v46 = vmul.f32 0.5, %v1331_v22 }
 0x2a6   :  { %v3490_v16 = vmul.f32 %v1587_v11, %v3421_v13  ;;  %v1468_v8 = vmul.f32 0.851, %v1224_v47  ;;  %v2186_v7 = vpop.eup %2185  ;;  %2197 = vtanh.f32 %v1467_v52  ;;  %v1470_v19 = vmul.f32 0.851, %v1337_v2 }
 0x2a7   :  { %v1693_v15 = vpack.c.bf16 %v3416_v9, %v3382_v3  ;;  %v1695_v24 = vpack.c.bf16 %v3419_v37, %v3396_v55  ;;  %v2188_v42 = vpop.eup %2187  ;;  %v3498_v51 = vmul.f32 0.5, %v1222_v10  ;;  %2199 = vtanh.f32 %v1469_v58  ;;  %v1072_v37 = vpop.permute.xlu0 %1071 }
 0x2a8   :  { %v1226_v56 = vadd.f32 %v3346_v4, %v1067_v59  ;;  %v1339_v13 = vadd.f32 %v3353_v49, %v1067_v59  ;;  %v3503_v39 = vmul.f32 %v1589_v31, %v3423_v26  ;;  %v3505_v52 = vmul.f32 0.5, %v1335_v62 }
 0x2a9   :  { %1730 = vmatprep.subr.bf16.mxu0 %v1693_v15  ;;  %1771 = vmatprep.subr.bf16.mxu1 %v1695_v24  ;;  %v1228_v3 = vadd.f32 %v3355_v36, %v1067_v59  ;;  %v1341_v55 = vadd.f32 %v3362_v12, %v1067_v59  ;;  %v1588_v60 = vadd.f32 1.0, %v2186_v7  ;;  %2201 = vtanh.f32 %v1468_v8 }
 0x2aa   :  { %v2190_v22 = vpop.eup %2189  ;;  %v1471_v4 = vmul.f32 0.851, %v1226_v56  ;;  %v3681_v49 = vpack.c.bf16 %v3364_v41, %v3340_v21  ;;  %v3682_v26 = vpack.c.bf16 %v3368_v61, %v3349_v30  ;;  %2203 = vtanh.f32 %v1470_v19 }
 0x2ab   :  { %v2192_v9 = vpop.eup %2191  ;;  %v1591_v63 = vadd.f32 1.0, %v2190_v22  ;;  %v1473_v36 = vmul.f32 0.851, %v1339_v13  ;;  %v1232_v12 = vadd.f32 %v3379_v45, %v1072_v37  ;;  %v3518_v31 = vmul.f32 0.5, %v1224_v47 }
 0x2ac   :  { %1731 = vmatpush1.bf16.msra.mxu0 %v3681_v49  ;;  %1772 = vmatpush1.bf16.msra.mxu1 %v3682_v26  ;;  %v2194_v11 = vpop.eup %2193  ;;  %v1593_v10 = vadd.f32 1.0, %v2192_v9  ;;  %2205 = vtanh.f32 %v1471_v4  ;;  %v1472_v58 = vmul.f32 0.851, %v1228_v3  ;;  %v1590_v7 = vadd.f32 1.0, %v2188_v42 }
 0x2ad   :  { %v3516_v62 = vmul.f32 %v1591_v63, %v1399_v50  ;;  %v2196_v8 = vpop.eup %2195  ;;  %2207 = vtanh.f32 %v1473_v36  ;;  %v1474_v41 = vmul.f32 0.851, %v1341_v55  ;;  %v3523_v30 = vmul.f32 %v1588_v60, %v3431_v57  ;;  %v3685_v36 = vld [vmem:[#allocation6_spill] sm:$0xff] }
 0x2ae   :  { %v3520_v21 = vmul.f32 %v1593_v10, %v1401_v43  ;;  %v1592_v59 = vadd.f32 1.0, %v2194_v11  ;;  %v3527_v45 = vmul.f32 0.5, %v1337_v2  ;;  %v1594_v50 = vadd.f32 1.0, %v2196_v8 }
 0x2af   :  { %v1700_v61 = vpack.c.bf16 %v3516_v62, %v3490_v16  ;;  %2209 = vtanh.f32 %v1472_v58  ;;  %v1475_v19 = vmul.f32 0.851, %v1232_v12  ;;  %v1345_v43 = vadd.f32 %v3387_v14, %v1072_v37 }
 0x2b0   :  { %v1702_v47 = vpack.c.bf16 %v3520_v21, %v3503_v39  ;;  %2211 = vtanh.f32 %v1474_v41  ;;  %v1234_v15 = vadd.f32 %v3389_v32, %v1072_v37  ;;  %v1347_v57 = vadd.f32 %v3391_v54, %v1072_v37  ;;  %v2198_v24 = vpop.eup %2197 }
 0x2b1   :  { %v3535_v42 = vmul.f32 %v1590_v7, %v3475_v48  ;;  %2213 = vtanh.f32 %v1475_v19  ;;  %v1697_v2 = vpack.c.bf16 %v3482_v35, %v3472_v18  ;;  %v1699_v22 = vpack.c.bf16 %v3487_v25, %v3479_v34  ;;  %v2200_v9 = vpop.eup %2199  ;;  %v1077_v35 = vpop.permute.xlu1 %1076 }
 0x2b2   :  { %v1407_v60 = vmul.f32 0.5, %v1226_v56  ;;  %v1409_v63 = vmul.f32 0.5, %v1339_v13  ;;  %v3541_v4 = vmul.f32 0.5, %v1228_v3  ;;  %v1477_v14 = vmul.f32 0.851, %v1345_v43 }
 0x2b3   :  { %v3544_v32 = vmul.f32 %v1592_v59, %v3484_v23  ;;  %v3546_v54 = vmul.f32 0.5, %v1341_v55  ;;  %v3548_v48 = vmul.f32 0.5, %v1232_v12  ;;  %v1476_v37 = vmul.f32 0.851, %v1234_v15  ;;  %1732 = vmatprep.subr.bf16.mxu0 %v1697_v2  ;;  %1773 = vmatprep.subr.bf16.mxu1 %v1699_v22  ;;  %v2202_v18 = vpop.eup %2201 }
 0x2b4   :  { %v3551_v34 = vmul.f32 %v1594_v50, %v3492_v46  ;;  %v1595_v25 = vadd.f32 1.0, %v2198_v24  ;;  %2215 = vtanh.f32 %v1477_v14  ;;  %v1478_v56 = vmul.f32 0.851, %v1347_v57  ;;  %v2204_v3 = vpop.eup %2203 }
 0x2b5   :  { %v3683_v13 = vpack.c.bf16 %v3447_v1, %v3429_v20  ;;  %v3684_v23 = vpack.c.bf16 %v3456_v29, %v3454_v53  ;;  %v1597_v55 = vadd.f32 1.0, %v2200_v9  ;;  %2217 = vtanh.f32 %v1476_v37 }
 0x2b6   :  { %v1236_v49 = vadd.f32 %v3393_v28, %v1077_v35  ;;  %v1349_v26 = vadd.f32 %v3398_v33, %v1077_v35  ;;  %v2206_v46 = vpop.eup %2205  ;;  %v3561_v11 = vmul.f32 0.5, %v1345_v43  ;;  %2219 = vtanh.f32 %v1478_v56  ;;  %v1082_v43 = vpop.permute.xlu0 %1081 }
 0x2b7   :  { %1733 = vmatpush1.bf16.msra.mxu0 %v3683_v13  ;;  %1774 = vmatpush1.bf16.msra.mxu1 %v3684_v23  ;;  %v1238_v10 = vadd.f32 %v3400_v27, %v1077_v35  ;;  %v1351_v20 = vadd.f32 %v3685_v36, %v1077_v35  ;;  %v2208_v1 = vpop.eup %2207  ;;  %v1596_v12 = vadd.f32 1.0, %v2202_v18  ;;  %v1599_v58 = vadd.f32 1.0, %v2206_v46 }
 0x2b8   :  { %v3565_v53 = vmul.f32 0.5, %v1234_v15  ;;  %v1479_v29 = vmul.f32 0.851, %v1236_v49  ;;  %v1598_v8 = vadd.f32 1.0, %v2204_v3  ;;  %v1601_v7 = vadd.f32 1.0, %v2208_v1 }
 0x2b9   :  { %v1481_v41 = vmul.f32 0.851, %v1349_v26  ;;  %v1480_v28 = vmul.f32 0.851, %v1238_v10  ;;  %v2210_v59 = vpop.eup %2209  ;;  %v3568_v33 = vmul.f32 %v1595_v25, %v3498_v51  ;;  %v3570_v50 = vmul.f32 %v1599_v58, %v1407_v60 }
 0x2ba   :  { %v3572_v19 = vmul.f32 0.5, %v1347_v57  ;;  %2221 = vtanh.f32 %v1479_v29  ;;  %v2212_v27 = vpop.eup %2211  ;;  %v3575_v24 = vmul.f32 %v1597_v55, %v3505_v52  ;;  %v3577_v15 = vmul.f32 %v1601_v7, %v1409_v63 }
 0x2bb   :  { %2223 = vtanh.f32 %v1481_v41  ;;  %v1482_v2 = vmul.f32 0.851, %v1351_v20  ;;  %v2214_v22 = vpop.eup %2213  ;;  %v3580_v9 = vmul.f32 %v1596_v12, %v3518_v31  ;;  %v1704_v51 = vpack.c.bf16 %v3570_v50, %v3568_v33 }
 0x2bc   :  { %2225 = vtanh.f32 %v1480_v28  ;;  %v3585_v57 = vadd.f32 %v3440_v0, %v1082_v43  ;;  %v3588_v60 = vmul.f32 %v1598_v8, %v3527_v45  ;;  %v1706_v52 = vpack.c.bf16 %v3577_v15, %v3575_v24 }
 0x2bd   :  { %v1600_v63 = vadd.f32 1.0, %v2210_v59  ;;  %2227 = vtanh.f32 %v1482_v2  ;;  %v1602_v14 = vadd.f32 1.0, %v2212_v27  ;;  %v1603_v37 = vadd.f32 1.0, %v2214_v22 }
 0x2be   :  { %v3593_v31 = vadd.f32 %v3443_v38, %v1082_v43  ;;  %v3596_v18 = vadd.f32 %v3445_v44, %v1082_v43  ;;  %v2216_v35 = vpop.eup %2215  ;;  %v1483_v0 = vmul.f32 0.851, %v3585_v57  ;;  %v3600_v25 = vadd.f32 %v3449_v6, %v1082_v43  ;;  %v1087_v6 = vpop.permute.xlu1 %1086 }
 0x2bf   :  { %v1701_v45 = vpack.c.bf16 %v3544_v32, %v3523_v30  ;;  %v1703_v56 = vpack.c.bf16 %v3551_v34, %v3535_v42  ;;  %v2218_v13 = vpop.eup %2217  ;;  %v1605_v23 = vadd.f32 1.0, %v2216_v35  ;;  %v1415_v3 = vmul.f32 0.5, %v1236_v49 }
 0x2c0   :  { %v1417_v38 = vmul.f32 0.5, %v1349_v26  ;;  %v1485_v55 = vmul.f32 0.851, %v3593_v31  ;;  %v2220_v44 = vpop.eup %2219  ;;  %v1604_v46 = vadd.f32 1.0, %v2218_v13  ;;  %v1416_v36 = vmul.f32 0.5, %v1238_v10 }
 0x2c1   :  { %v1418_v1 = vmul.f32 0.5, %v1351_v20  ;;  %v1484_v12 = vmul.f32 0.851, %v3596_v18  ;;  %1734 = vmatprep.subr.bf16.mxu0 %v1701_v45  ;;  %1775 = vmatprep.subr.bf16.mxu1 %v1703_v56  ;;  %v1664_v30 = vmul.f32 %v1600_v63, %v3541_v4  ;;  %v1666_v32 = vmul.f32 %v1602_v14, %v3546_v54  ;;  %v3686_v20 = vld [vmem:[#allocation7_spill] sm:$0xff] }
 0x2c2   :  { %v1667_v42 = vmul.f32 %v1603_v37, %v3548_v48  ;;  %v1486_v34 = vmul.f32 0.851, %v3600_v25  ;;  %1735 = vmatpush1.bf16.msra.mxu0 %v1700_v61  ;;  %1776 = vmatpush1.bf16.msra.mxu1 %v1702_v47  ;;  %v1606_v49 = vadd.f32 1.0, %v2220_v44  ;;  %2229 = vtanh.f32 %v1483_v0 }
 0x2c3   :  { %v1246_v26 = vadd.f32 %v3451_v17, %v1087_v6  ;;  %v1359_v4 = vadd.f32 %v3458_v40, %v1087_v6  ;;  %v1669_v54 = vmul.f32 %v1605_v23, %v3561_v11  ;;  %2231 = vtanh.f32 %v1485_v55 }
 0x2c4   :  { %v2222_v10 = vpop.eup %2221  ;;  %v1248_v48 = vadd.f32 %v3460_v5, %v1087_v6  ;;  %v3623_v58 = vadd.f32 %v3686_v20, %v1087_v6  ;;  %v1668_v62 = vmul.f32 %v1604_v46, %v3565_v53  ;;  %2233 = vtanh.f32 %v1484_v12 }
 0x2c5   :  { %v2224_v16 = vpop.eup %2223  ;;  %v1607_v39 = vadd.f32 1.0, %v2222_v10  ;;  %v1487_v21 = vmul.f32 0.851, %v1246_v26  ;;  %2235 = vtanh.f32 %v1486_v34  ;;  %v1489_v17 = vmul.f32 0.851, %v1359_v4 }
 0x2c6   :  { %v2226_v61 = vpop.eup %2225  ;;  %v1609_v47 = vadd.f32 1.0, %v2224_v16  ;;  %v1488_v40 = vmul.f32 0.851, %v1248_v48  ;;  %v1670_v11 = vmul.f32 %v1606_v49, %v3572_v19  ;;  %v1490_v28 = vmul.f32 0.851, %v3623_v58 }
 0x2c7   :  { %v2228_v29 = vpop.eup %2227  ;;  %v1671_v8 = vmul.f32 %v1607_v39, %v1415_v3  ;;  %v1608_v7 = vadd.f32 1.0, %v2226_v61  ;;  %2237 = vtanh.f32 %v1487_v21  ;;  %v1705_v27 = vpack.c.bf16 %v1664_v30, %v3580_v9 }
 0x2c8   :  { %v1673_v5 = vmul.f32 %v1609_v47, %v1417_v38  ;;  %v1610_v41 = vadd.f32 1.0, %v2228_v29  ;;  %2239 = vtanh.f32 %v1489_v17  ;;  %v1707_v22 = vpack.c.bf16 %v1666_v32, %v3588_v60 }
 0x2c9   :  { %v1708_v53 = vpack.c.bf16 %v1671_v8, %v1667_v42  ;;  %v1672_v59 = vmul.f32 %v1608_v7, %v1416_v36  ;;  %2241 = vtanh.f32 %v1488_v40  ;;  %1736 = vmatprep.subr.bf16.mxu0 %v1705_v27  ;;  %v1419_v45 = vmul.f32 0.5, %v3585_v57 }
 0x2ca   :  { %v1710_v43 = vpack.c.bf16 %v1673_v5, %v1669_v54  ;;  %v1674_v2 = vmul.f32 %v1610_v41, %v1418_v1  ;;  %2243 = vtanh.f32 %v1490_v28  ;;  %1777 = vmatprep.subr.bf16.mxu1 %v1707_v22  ;;  %1737 = vmatpush1.bf16.msra.mxu0 %v1704_v51  ;;  %v1421_v56 = vmul.f32 0.5, %v3593_v31 }
 0x2cb   :  { %v1709_v19 = vpack.c.bf16 %v1672_v59, %v1668_v62  ;;  %1778 = vmatpush1.bf16.msra.mxu1 %v1706_v52  ;;  %v1420_v51 = vmul.f32 0.5, %v3596_v18  ;;  %v1423_v24 = vmul.f32 0.5, %v1246_v26  ;;  %v1422_v23 = vmul.f32 0.5, %v3600_v25  ;;  %v1720_v62 = vpop.permute.xlu0 %1719 }
 0x2cc   :  { %v1711_v63 = vpack.c.bf16 %v1674_v2, %v1670_v11  ;;  %v2230_v14 = vpop.eup %2229  ;;  %v1425_v38 = vmul.f32 0.5, %v1359_v4  ;;  %v1424_v57 = vmul.f32 0.5, %v1248_v48  ;;  %v1426_v6 = vmul.f32 0.5, %v3623_v58  ;;  %v1683_v4 = vld [vmem:[%s3661_s5] sm:$0x1]  ;;  %s2271_s5 = smov [#allocation3]  }
 0x2cd   :  { %1738 = vmatprep.subr.bf16.mxu0 %v1709_v19  ;;  %v2232_v9 = vpop.eup %2231  ;;  %v1611_v0 = vadd.f32 1.0, %v2230_v14  ;;  %v1722_v54 = vlaneseq  ;;  %v2270_v20 = vmov 1966171168   ;;  %s1848_s27 = sshll.u32 %s2271_s5, 4  ;;  %s1849_s27 = int_to_ptr.vmem [resolvable:$true] %s1848_s27 }
 0x2ce   :  { %1779 = vmatprep.subr.bf16.mxu1 %v1711_v63  ;;  %v2234_v37 = vpop.eup %2233  ;;  %1739 = vmatpush1.bf16.msra.mxu0 %v1708_v53  ;;  %v1613_v33 = vadd.f32 1.0, %v2232_v9  ;;  %v1815_v58 = vunpack.c.l.s4 %v2270_v20  ;;  %s2245_s28 = scalar_lea.vmem %s1849_s27, 64  ;;  %p2250_p1 = scmp.lt.s32.totalorder %s1849_s27, %s1849_s27 }
 0x2cf   :  { %v2236_v35 = vpop.eup %2235  ;;  %1780 = vmatpush1.bf16.msra.mxu1 %v1710_v43  ;;  %v1612_v13 = vadd.f32 1.0, %v2234_v37  ;;  %v1675_v46 = vmul.f32 %v1611_v0, %v1419_v45  ;;  %v1723_v48 = vshrl.u32 %v1722_v54, 7  ;;  %vm1839_vm1 = vcmp.lt.s32.totalorder %v1722_v54, 512  ;;  %p2246_p0 = scmp.ne.s32.totalorder %s1849_s27, %s2245_s28  ;;  %p2251_p2 = scmp.lt.s32.totalorder %s2245_s28, %s2245_s28 }
 0x2d0   :  { %v1614_v3 = vadd.f32 1.0, %v2236_v35  ;;  %v1677_v31 = vmul.f32 %v1613_v33, %v1421_v56  ;;  %v1816_v39 = vunpack.c.0.s8 %v1815_v58 }
 0x2d1   :  { %v2238_v60 = vpop.eup %2237  ;;  %v1676_v18 = vmul.f32 %v1612_v13, %v1420_v51  ;;  %v1724_v16 = vsub.s32 0, %v1723_v48  ;;  %p2252_p3 = por %p2251_p2, %p2250_p1 }
 0x2d2   :  { %v2240_v50 = vpop.eup %2239  ;;  %v1615_v15 = vadd.f32 1.0, %v2238_v60  ;;  %v1678_v34 = vmul.f32 %v1614_v3, %v1422_v23  ;;  %v1819_v29 = vsub.s32 %v1816_v39, %v1723_v48 }
 0x2d3   :  { %v2242_v52 = vpop.eup %2241  ;;  %v1617_v55 = vadd.f32 1.0, %v2240_v50  ;;  %v1725_v21 = vrot.slane %v1720_v62, %v1724_v16  ;;  %p2253_p4 = pnand %p2252_p3, %p2246_p0 }
 0x2d4   :  { %v2244_v44 = vpop.eup %2243  ;;  %v1679_v36 = vmul.f32 %v1615_v15, %v1423_v24  ;;  %v1616_v1 = vadd.f32 1.0, %v2242_v52 }
 0x2d5   :  { %v1681_v12 = vmul.f32 %v1617_v55, %v1425_v38  ;;  %v1618_v30 = vadd.f32 1.0, %v2244_v44 }
 0x2d6   :  { %v1712_v32 = vpack.c.bf16 %v1679_v36, %v1675_v46  ;;  %v1680_v42 = vmul.f32 %v1616_v1, %v1424_v57 }
 0x2d7   :  { %v1714_v49 = vpack.c.bf16 %v1681_v12, %v1677_v31  ;;  %v1682_v26 = vmul.f32 %v1618_v30, %v1426_v6 }
 0x2d8   :  { %v1713_v25 = vpack.c.bf16 %v1680_v42, %v1676_v18 }
 0x2d9   :  { %v1715_v10 = vpack.c.bf16 %v1682_v26, %v1678_v34 }
 0x2da   :  { %1740 = vmatprep.subr.bf16.mxu0 %v1713_v25 }
 0x2db   :  { %1781 = vmatprep.subr.bf16.mxu1 %v1715_v10  ;;  %1741 = vmatpush1.bf16.msra.mxu0 %v1712_v32 }
 0x2dc   :  { %1782 = vmatpush1.bf16.msra.mxu1 %v1714_v49 }
 0x2de   :  { %1759 = vmatmul.mubr.bf16.vlgmr.msra.gmra.mrb[64].mxu0 %v1683_v4 }
 0x2df   :  { %1800 = vmatmul.mubr.bf16.vlgmr.msra.gmra.mrb[64].mxu1 %v1683_v4 }
 0x3b1   :  { %v1760_v61 = vpop.f32.mrb[64].mxu0 }
 0x3b2   :  { %v1761_v47 = vadd.f32 %v1760_v61, %v1725_v21  ;;  %v1801_v17 = vpop.f32.mrb[64].mxu1  ;;  %v1762_v40 = vpop.f32.mrb[65].mxu0 }
 0x3b3   :  { %v1802_v11 = vadd.f32 %v1801_v17, %v1725_v21  ;;  %v1763_v8 = vadd.f32 %v1762_v40, %v1725_v21  ;;  %v1803_v7 = vpop.f32.mrb[65].mxu1  ;;  %v1764_v5 = vpop.f32.mrb[66].mxu0 }
 0x3b4   :  { %v1804_v41 = vadd.f32 %v1803_v7, %v1725_v21  ;;  %v1805_v28 = vpop.f32.mrb[66].mxu1  ;;  %v1765_v53 = vpop.f32.mrb[67].mxu0 }
 0x3b5   :  { %v1812_v59 = vcombine.low %v1761_v47, %v1763_v8  ;;  %v1806_v27 = vpop.f32.mrb[67].mxu1 }
 0x3b6   :  { %v1813_v43 = vcombine.low %v1802_v11, %v1804_v41 }
 0x3b7   :  { %v1820_v2 = vrot.slane %v1812_v59, %v1819_v29 }
 0x3b8   :  { %v1827_v22 = vrot.slane %v1813_v43, %v1819_v29 }
 0x3ba   :  { %v1828_v19 = vcombine.low %v1820_v2, %v1827_v22 }
 0x3bc   :  { %v1835_v63 = vrot.slane %v1828_v19, %v1819_v29 }
 0x3be   :  { %1841 = vst.msk [vmem:[#allocation3] sm:$0xf] %vm1839_vm1, %v1835_v63 }
 0x3bf   :  { %2256 = shalt.err (!%p2253_p4)
}
 0x3c0   :  { %s2257_s8 = scalar_lea.hbm %s3663_s7, 64 }
 0x3c1   :  { %p2258_p5 = scmp.ne.s32.totalorder %s3663_s7, %s2257_s8  ;;  %p2261_p6 = scmp.lt.u32.totalorder %s2257_s8, %s3663_s7 }
 0x3c3   :  { %p2263_p7 = pnand %p2261_p6, %p2258_p5 }
 0x3c5   :  { %2266 = shalt.err (!%p2263_p7)
}
 0x3c6   :  { %1851 = dma.vmem_to_hbm [thread:$0]  %s1849_s27, 64, %s3663_s7, [#allocation4]  }
 0x3c7   :  { %2267 = dma.done.wait [#allocation4], 64  }
 0x3c8   :  { %2268 = vsyncadd [#allocation4], 4294967232 }
 0x3c9   :  { %1855 = vsyncpa [#allocation4], 1 }

</bundles_post_ra>
